<compile_context>
chip_gen: v7x
topology: tpu7x:2x2x1
jax: 0.10.0
libtpu: 0.0.40
codegen_flags: <defaults>
</compile_context>

<pallas_src>
import functools

import jax
import jax.numpy as jnp
from jax.experimental import pallas as pl
from jax.experimental.pallas import tpu as pltpu

LEAKY_SLOPE = 0.2
BN_EPS = 1e-5

# Rows per M tile.  Kept small so the toy test exercises the multi-tile /
# BN-stats-accumulation path; bump to 512-1024 for production DCGAN shapes.
_TM_MAX = 128
_VMEM_LIMIT = 32 * 1024 * 1024


# ----------------------------- Pallas kernels ------------------------------ #

def _gemm_colstats_kernel(p_ref, w_ref, stats_ref):
    """grid = (N tiles ['parallel'], M tiles ['arbitrary']).
    Accumulates per-column sum and sum-of-squares of y = P @ W in f32."""
    m = pl.program_id(1)
    y = jnp.dot(p_ref[...], w_ref[...], preferred_element_type=jnp.float32)
    tile = jnp.concatenate(
        [jnp.sum(y, axis=0, keepdims=True),
         jnp.sum(y * y, axis=0, keepdims=True)], axis=0)       # (2, TN)

    @pl.when(m == 0)
    def _():
        stats_ref[...] = tile

    @pl.when(m > 0)
    def _():
        stats_ref[...] += tile


def _gemm_affine_lrelu_kernel(p_ref, w_ref, scale_ref, shift_ref, o_ref):
    """y = P @ W ; out = leaky_relu(y*scale + shift).  Single FMA epilogue."""
    y = jnp.dot(p_ref[...], w_ref[...], preferred_element_type=jnp.float32)
    t = y * scale_ref[...] + shift_ref[...]
    o_ref[...] = jnp.where(t >= 0.0, t, LEAKY_SLOPE * t).astype(o_ref.dtype)


def _gemm_bias_tanh_kernel(p_ref, w_ref, b_ref, o_ref):
    """y = P @ W ; out = tanh(y + bias) (final layer)."""
    y = jnp.dot(p_ref[...], w_ref[...], preferred_element_type=jnp.float32)
    o_ref[...] = jnp.tanh(y + b_ref[...]).astype(o_ref.dtype)


# ------------------------- pallas_call wrappers ----------------------------- #

def _round_up(x, m):
    return ((x + m - 1) // m) * m


def _m_tiling(M):
    if M <= _TM_MAX:
        return M, M
    return _TM_MAX, _round_up(M, _TM_MAX)


def _n_tile(Npad):
    return 256 if Npad % 256 == 0 else 128


def _compiler_params(semantics):
    return pltpu.CompilerParams(dimension_semantics=semantics,
                                vmem_limit_bytes=_VMEM_LIMIT)


def _call_colstats(Pb, Wb, TM, TN):
    Mpad, K = Pb.shape
    Npad = Wb.shape[1]
    return pl.pallas_call(
        _gemm_colstats_kernel,
        out_shape=jax.ShapeDtypeStruct((2, Npad), jnp.float32),
        grid_spec=pltpu.PrefetchScalarGridSpec(
            num_scalar_prefetch=0,
            grid=(Npad // TN, Mpad // TM),
            in_specs=[pl.BlockSpec((TM, K), lambda n, m: (m, 0)),
                      pl.BlockSpec((K, TN), lambda n, m: (0, n))],
            out_specs=pl.BlockSpec((2, TN), lambda n, m: (0, n))),
        compiler_params=_compiler_params(("parallel", "arbitrary")),
    )(Pb, Wb)


def _call_affine_lrelu(Pb, Wb, scale, shift, TM, TN):
    Mpad, K = Pb.shape
    Npad = Wb.shape[1]
    return pl.pallas_call(
        _gemm_affine_lrelu_kernel,
        out_shape=jax.ShapeDtypeStruct((Mpad, Npad), jnp.bfloat16),
        grid_spec=pltpu.PrefetchScalarGridSpec(
            num_scalar_prefetch=0,
            grid=(Mpad // TM, Npad // TN),
            in_specs=[pl.BlockSpec((TM, K), lambda m, n: (m, 0)),
                      pl.BlockSpec((K, TN), lambda m, n: (0, n)),
                      pl.BlockSpec((1, TN), lambda m, n: (0, n)),
                      pl.BlockSpec((1, TN), lambda m, n: (0, n))],
            out_specs=pl.BlockSpec((TM, TN), lambda m, n: (m, n))),
        compiler_params=_compiler_params(("parallel", "parallel")),
    )(Pb, Wb, scale, shift)


def _call_bias_tanh(Pb, Wb, bias, TM, TN):
    Mpad, K = Pb.shape
    Npad = Wb.shape[1]
    return pl.pallas_call(
        _gemm_bias_tanh_kernel,
        out_shape=jax.ShapeDtypeStruct((Mpad, Npad), jnp.bfloat16),
        grid_spec=pltpu.PrefetchScalarGridSpec(
            num_scalar_prefetch=0,
            grid=(Mpad // TM, Npad // TN),
            in_specs=[pl.BlockSpec((TM, K), lambda m, n: (m, 0)),
                      pl.BlockSpec((K, TN), lambda m, n: (0, n)),
                      pl.BlockSpec((1, TN), lambda m, n: (0, n))],
            out_specs=pl.BlockSpec((TM, TN), lambda m, n: (m, n))),
        compiler_params=_compiler_params(("parallel", "parallel")),
    )(Pb, Wb, bias)


# ------------------------------- JAX glue ----------------------------------- #

def _im2col_for_convT_nhwc(x, k, s):
    """General ConvTranspose2d(kernel=k, stride=s, pad=0) fallback via
    zero-dilated im2col.  x: (B, Hin, Win, Cin) -> (B*Hout*Wout, Cin*k*k)."""
    B, Hin, Win, Cin = x.shape
    Hout = (Hin - 1) * s + k
    Wout = (Win - 1) * s + k
    xd = jnp.zeros((B, (Hin - 1) * s + 1, (Win - 1) * s + 1, Cin), x.dtype)
    xd = xd.at[:, ::s, ::s, :].set(x)
    xp = jnp.pad(xd, ((0, 0), (k - 1, k - 1), (k - 1, k - 1), (0, 0)))
    cols = [xp[:, kh:kh + Hout, kw:kw + Wout, :]
            for kh in range(k) for kw in range(k)]
    p = jnp.stack(cols, axis=-1)                   # (B, Hout, Wout, Cin, k*k)
    return p.reshape(B * Hout * Wout, Cin * k * k), Hout, Wout


def _conv_transpose_layer(x, arrs, lm):
    """One fused ConvTranspose2d(+BN+LeakyReLU | +Tanh) layer.  NHWC in/out."""
    B, Hin, Win, _ = x.shape
    k, s = lm["k"], lm["s"]
    Cout, groups, N, Npad = lm["Cout"], lm["groups"], lm["N"], lm["Npad"]
    Wb = arrs["Wf"]                                # (K, Npad) bf16, prepared once
    K = Wb.shape[0]

    if lm["fast"]:
        M = B * Hin * Win
        P = x.reshape(M, K)
        Hout, Wout = Hin * k, Win * k              # valid for k==s or 1x1 input
    else:
        # TODO(synk): k != s fallback still materializes a zero-dilated im2col
        # in HBM; a sub-pixel (s^2 interleaved pixel-shuffle GEMMs) split would
        # avoid feeding structural zeros to the MXU on classic k=4,s=2 layers.
        P, Hout, Wout = _im2col_for_convT_nhwc(x, k, s)
        M = P.shape[0]

    Pb = P.astype(jnp.bfloat16)
    TM, Mpad = _m_tiling(M)
    if Mpad > M:
        # zero rows: contribute exactly 0 to both sum and sum-of-squares
        Pb = jnp.pad(Pb, ((0, Mpad - M), (0, 0)))
    TN = _n_tile(Npad)

    if lm["final"]:
        y = _call_bias_tanh(Pb, Wb, arrs["bias_full"], TM, TN)
    else:
        stats = _call_colstats(Pb, Wb, TM, TN)                 # (2, Npad) f32
        inv_n = 1.0 / float(M * groups)
        per_chan = stats[:, :N].reshape(2, groups, Cout).sum(axis=1)  # (2, Cout)
        mean = per_chan[0] * inv_n
        var = jnp.maximum(per_chan[1] * inv_n - mean * mean, 0.0)
        scale_c = arrs["gamma"] * jax.lax.rsqrt(var + BN_EPS)
        shift_c = arrs["beta"] - mean * scale_c
        scale = jnp.pad(jnp.tile(scale_c, groups), (0, Npad - N)).reshape(1, Npad)
        shift = jnp.pad(jnp.tile(shift_c, groups), (0, Npad - N)).reshape(1, Npad)
        y = _call_affine_lrelu(Pb, Wb, scale, shift, TM, TN)

    y = y[:M, :N]
    if lm["fast"]:
        # depth-to-space: (B*Hin*Win, k*k*Cout) -> (B, Hin*k, Win*k, Cout)
        # TODO(synk): could be folded into the output BlockSpec index_map to
        # save one HBM round trip of the activation per layer.
        y = y.reshape(B, Hin, Win, k, k, Cout)
        y = y.transpose(0, 1, 3, 2, 4, 5).reshape(B, Hout, Wout, Cout)
    else:
        y = y.reshape(B, Hout, Wout, Cout)
    return y


# --------------------------- Generator (params) ----------------------------- #

def init_generator_params(key, kernels, input_dim, image_channels, hidden_dim):
    chans = [input_dim, hidden_dim * 8, hidden_dim * 4, hidden_dim * 2,
             hidden_dim, image_channels]
    params = []
    for i in range(5):
        key, k1, k2 = jax.random.split(key, 3)
        cin, cout, k = chans[i], chans[i + 1], kernels[i]
        W = 0.05 * jax.random.normal(k1, (cin, cout, k, k), jnp.float32)
        b = 0.05 * jax.random.normal(k2, (cout,), jnp.float32)
        if i < 4:
            gamma = jnp.ones((cout,), jnp.float32)   # BatchNorm2d default affine
            beta = jnp.zeros((cout,), jnp.float32)
        else:
            gamma = beta = None
        params.append(dict(W=W, b=b, gamma=gamma, beta=beta))
    return params


def prepare_generator_params(params, kernels, strides):
    """One-time prep: GEMM-ready bf16 weights (lane-padded), tiled final bias,
    f32 gamma/beta, plus static per-layer metadata kept out of the jit args."""
    n_layers = len(params)
    arrays, meta = [], []
    for i, p in enumerate(params):
        k, s = kernels[i], strides[i]
        W = p["W"]                                   # (Cin, Cout, k, k)
        Cin, Cout = int(W.shape[0]), int(W.shape[1])
        final = (i == n_layers - 1)
        fast = (k == s) or (i == 0)                  # layer 0 has a 1x1 input
        if fast:
            Wf = jnp.transpose(W, (0, 2, 3, 1)).reshape(Cin, k * k * Cout)
            groups = k * k
        else:
            Wf = jnp.flip(W, axis=(2, 3)).transpose(0, 2, 3, 1).reshape(
                Cin * k * k, Cout)
            groups = 1
        N = int(Wf.shape[1])
        Npad = _round_up(N, 128)
        Wf = jnp.pad(Wf, ((0, 0), (0, Npad - N))).astype(jnp.bfloat16)
        arr = {"Wf": Wf}
        if final:
            bias = jnp.tile(p["b"].astype(jnp.float32), groups)
            arr["bias_full"] = jnp.pad(bias, (0, Npad - N)).reshape(1, Npad)
        else:
            # conv bias intentionally dropped: cancelled exactly by BN's mean
            # subtraction.
            arr["gamma"] = p["gamma"].astype(jnp.float32)
            arr["beta"] = p["beta"].astype(jnp.float32)
        arrays.append(arr)
        meta.append(dict(k=k, s=s, Cout=Cout, groups=groups, N=N, Npad=Npad,
                         fast=fast, final=final))
    return arrays, tuple(meta)


def generator_forward(noise, layer_arrays, *, meta, input_dim):
    B = noise.shape[0]
    x = noise.reshape(B, 1, 1, input_dim).astype(jnp.bfloat16)   # NHWC, H=W=1
    for arrs, lm in zip(layer_arrays, meta):
        x = _conv_transpose_layer(x, arrs, lm)
    return x.astype(jnp.float32).transpose(0, 3, 1, 2)   # single NHWC -> NCHW


# ----------------------- pure-JAX reference (f32) --------------------------- #
# Independent zero-dilation im2col lowering (not pixel-shuffle) so it genuinely
# validates the Pallas kernels and the fast-path lowering.

def _im2col_for_convT_nchw(x, k, s):
    B, Cin, Hin, Win = x.shape
    Hout = (Hin - 1) * s + k
    Wout = (Win - 1) * s + k
    xd = jnp.zeros((B, Cin, (Hin - 1) * s + 1, (Win - 1) * s + 1), x.dtype)
    xd = xd.at[:, :, ::s, ::s].set(x)
    xp = jnp.pad(xd, ((0, 0), (0, 0), (k - 1, k - 1), (k - 1, k - 1)))
    cols = [xp[:, :, kh:kh + Hout, kw:kw + Wout]
            for kh in range(k) for kw in range(k)]
    p = jnp.stack(cols, axis=0)                    # (k*k, B, Cin, Hout, Wout)
    p = jnp.transpose(p, (1, 3, 4, 2, 0))          # (B, Hout, Wout, Cin, k*k)
    return p.reshape(B * Hout * Wout, Cin * k * k), Hout, Wout


def _reference_forward(noise, params, kernels, strides, input_dim):
    x = noise.reshape(noise.shape[0], input_dim, 1, 1)           # NCHW
    n_layers = len(params)
    for i, p in enumerate(params):
        k, s = kernels[i], strides[i]
        B, Cin = x.shape[0], x.shape[1]
        Cout = p["W"].shape[1]
        P, Hout, Wout = _im2col_for_convT_nchw(x, k, s)
        Wf = jnp.flip(p["W"], axis=(2, 3)).transpose(0, 2, 3, 1).reshape(
            Cin * k * k, Cout)
        y = jnp.dot(P, Wf, precision=jax.lax.Precision.HIGHEST) + p["b"][None, :]
        if i < n_layers - 1:
            mean = jnp.mean(y, axis=0, keepdims=True)
            var = jnp.mean((y - mean) ** 2, axis=0, keepdims=True)
            y = (y - mean) * jax.lax.rsqrt(var + BN_EPS)
            y = y * p["gamma"][None, :] + p["beta"][None, :]
            y = jnp.where(y >= 0.0, y, LEAKY_SLOPE * y)
        else:
            y = jnp.tanh(y)
        x = y.reshape(B, Hout, Wout, Cout).transpose(0, 3, 1, 2)
    return x


# ---------------------------------- main ------------------------------------ #

if __name__ == "__main__":
    # small, module-consistent config (k == s for the strided layers so the
    # pixel-shuffle fast path is exercised everywhere); batch chosen so the
    # BN-stats accumulation runs over multiple M tiles.
    kernels = (2, 2, 2, 2, 2)
    strides = (1, 2, 2, 2, 2)
    input_dim = 16
    hidden_dim = 8
    image_channels = 4
    batch = 4

    key = jax.random.PRNGKey(0)
    pkey, nkey = jax.random.split(key)
    params = init_generator_params(pkey, kernels, input_dim,
                                   image_channels, hidden_dim)
    noise = jax.random.normal(nkey, (batch, input_dim), jnp.float32)

    layer_arrays, meta = prepare_generator_params(params, kernels, strides)

    fwd = jax.jit(functools.partial(generator_forward, meta=meta,
                                    input_dim=input_dim))
    out = jax.block_until_ready(fwd(noise, layer_arrays))

    # shape check: 1 -> 2 -> 4 -> 8 -> 16 -> 32 spatial, image_channels channels
    assert out.shape == (batch, image_channels, 32, 32), out.shape

    ref = jax.block_until_ready(
        _reference_forward(noise, params, kernels, strides, input_dim))
    err = float(jnp.max(jnp.abs(out - ref)))
    assert err < 5e-2, err   # tolerance absorbs bf16 MXU inputs / bf16 output

    print("KERNEL_OK")
</pallas_src>

<mosaic_0001>
module attributes {stable_mosaic.version = 11 : i64} {
  func.func @_gemm_colstats_kernel(%arg0: i32, %arg1: i32, %arg2: memref<4x16xbf16, #tpu.memory_space<vmem>>, %arg3: memref<16x256xbf16, #tpu.memory_space<vmem>>, %arg4: memref<2x256xf32, #tpu.memory_space<vmem>>) attributes {dimension_semantics = [#tpu.dimension_semantics<parallel>, #tpu.dimension_semantics<arbitrary>], iteration_bounds = array<i64: 1, 1>, scalar_prefetch = 0 : i64, scratch_operands = 0 : i64, tpu.core_type = #tpu.core_type<tc>, window_params = [{transform_indices = @transform_0, window_bounds = array<i64: 4, 16>}, {transform_indices = @transform_1, window_bounds = array<i64: 16, 256>}, {transform_indices = @transform_2, window_bounds = array<i64: 2, 256>}]} {
    %c0 = arith.constant 0 : index
    %c0_0 = arith.constant 0 : index
    %0 = vector.load %arg2[%c0, %c0_0] : memref<4x16xbf16, #tpu.memory_space<vmem>>, vector<4x16xbf16>
    %c0_1 = arith.constant 0 : index
    %c0_2 = arith.constant 0 : index
    %1 = vector.load %arg3[%c0_1, %c0_2] : memref<16x256xbf16, #tpu.memory_space<vmem>>, vector<16x256xbf16>
    %cst = arith.constant dense<0.000000e+00> : vector<4x256xf32>
    %2 = tpu.matmul %0, %1, %cst {dimension_numbers = #tpu.dot_dimension_numbers<[1], [0], [0], [1], [0, 0, 1, 1], [], []>} : vector<4x16xbf16>, vector<16x256xbf16>, vector<4x256xf32> -> vector<4x256xf32>
    %cst_3 = arith.constant dense<0.000000e+00> : vector<256xf32>
    %3 = vector.multi_reduction <add>, %2, %cst_3 [0] : vector<4x256xf32> to vector<256xf32>
    %4 = vector.shape_cast %3 : vector<256xf32> to vector<1x256xf32>
    %5 = arith.mulf %2, %2 : vector<4x256xf32>
    %cst_4 = arith.constant dense<0.000000e+00> : vector<256xf32>
    %6 = vector.multi_reduction <add>, %5, %cst_4 [0] : vector<4x256xf32> to vector<256xf32>
    %7 = vector.shape_cast %6 : vector<256xf32> to vector<1x256xf32>
    %8 = tpu.concatenate %4, %7 in 0 : vector<1x256xf32>, vector<1x256xf32> -> vector<2x256xf32>
    %c0_i32 = arith.constant 0 : i32
    %9 = arith.cmpi eq, %arg1, %c0_i32 : i32
    %10 = arith.extui %9 : i1 to i32
    %c0_i32_5 = arith.constant 0 : i32
    %11 = arith.cmpi ne, %10, %c0_i32_5 : i32
    scf.if %11 {
      %c0_8 = arith.constant 0 : index
      %c0_9 = arith.constant 0 : index
      %15 = vector.load %arg4[%c0_8, %c0_9] : memref<2x256xf32, #tpu.memory_space<vmem>>, vector<2x256xf32>
      tpu.vector_store %arg4[%c0_8, %c0_9], %8 {strides = array<i32>} : memref<2x256xf32, #tpu.memory_space<vmem>>, vector<2x256xf32>,
    } else {
    }
    %c0_i32_6 = arith.constant 0 : i32
    %12 = arith.cmpi sgt, %arg1, %c0_i32_6 : i32
    %13 = arith.extui %12 : i1 to i32
    %c0_i32_7 = arith.constant 0 : i32
    %14 = arith.cmpi ne, %13, %c0_i32_7 : i32
    scf.if %14 {
      %c0_8 = arith.constant 0 : index
      %c0_9 = arith.constant 0 : index
      %15 = vector.load %arg4[%c0_8, %c0_9] : memref<2x256xf32, #tpu.memory_space<vmem>>, vector<2x256xf32>
      %16 = arith.addf %15, %8 : vector<2x256xf32>
      %c0_10 = arith.constant 0 : index
      %c0_11 = arith.constant 0 : index
      %17 = vector.load %arg4[%c0_10, %c0_11] : memref<2x256xf32, #tpu.memory_space<vmem>>, vector<2x256xf32>
      tpu.vector_store %arg4[%c0_10, %c0_11], %16 {strides = array<i32>} : memref<2x256xf32, #tpu.memory_space<vmem>>, vector<2x256xf32>,
    } else {
    }
    return
  }
  func.func @transform_0(%arg0: i32, %arg1: i32) -> (i32, i32) {
    %c0_i32 = arith.constant 0 : i32
    %c0_i32_0 = arith.constant 0 : i32
    return %arg1, %c0_i32 : i32, i32
  }
  func.func @transform_1(%arg0: i32, %arg1: i32) -> (i32, i32) {
    %c0_i32 = arith.constant 0 : i32
    %c0_i32_0 = arith.constant 0 : i32
    return %c0_i32, %arg0 : i32, i32
  }
  func.func @transform_2(%arg0: i32, %arg1: i32) -> (i32, i32) {
    %c0_i32 = arith.constant 0 : i32
    %c0_i32_0 = arith.constant 0 : i32
    return %c0_i32, %arg0 : i32, i32
  }
}

module attributes {stable_mosaic.version = 11 : i64} {
  func.func @_gemm_colstats_kernel(%arg0: i32, %arg1: i32, %arg2: memref<16x64xbf16, #tpu.memory_space<vmem>>, %arg3: memref<64x128xbf16, #tpu.memory_space<vmem>>, %arg4: memref<2x128xf32, #tpu.memory_space<vmem>>) attributes {dimension_semantics = [#tpu.dimension_semantics<parallel>, #tpu.dimension_semantics<arbitrary>], iteration_bounds = array<i64: 1, 1>, scalar_prefetch = 0 : i64, scratch_operands = 0 : i64, tpu.core_type = #tpu.core_type<tc>, window_params = [{transform_indices = @transform_0, window_bounds = array<i64: 16, 64>}, {transform_indices = @transform_1, window_bounds = array<i64: 64, 128>}, {transform_indices = @transform_2, window_bounds = array<i64: 2, 128>}]} {
    %c0 = arith.constant 0 : index
    %c0_0 = arith.constant 0 : index
    %0 = vector.load %arg2[%c0, %c0_0] : memref<16x64xbf16, #tpu.memory_space<vmem>>, vector<16x64xbf16>
    %c0_1 = arith.constant 0 : index
    %c0_2 = arith.constant 0 : index
    %1 = vector.load %arg3[%c0_1, %c0_2] : memref<64x128xbf16, #tpu.memory_space<vmem>>, vector<64x128xbf16>
    %cst = arith.constant dense<0.000000e+00> : vector<16x128xf32>
    %2 = tpu.matmul %0, %1, %cst {dimension_numbers = #tpu.dot_dimension_numbers<[1], [0], [0], [1], [0, 0, 1, 1], [], []>} : vector<16x64xbf16>, vector<64x128xbf16>, vector<16x128xf32> -> vector<16x128xf32>
    %cst_3 = arith.constant dense<0.000000e+00> : vector<128xf32>
    %3 = vector.multi_reduction <add>, %2, %cst_3 [0] : vector<16x128xf32> to vector<128xf32>
    %4 = vector.shape_cast %3 : vector<128xf32> to vector<1x128xf32>
    %5 = arith.mulf %2, %2 : vector<16x128xf32>
    %cst_4 = arith.constant dense<0.000000e+00> : vector<128xf32>
    %6 = vector.multi_reduction <add>, %5, %cst_4 [0] : vector<16x128xf32> to vector<128xf32>
    %7 = vector.shape_cast %6 : vector<128xf32> to vector<1x128xf32>
    %8 = tpu.concatenate %4, %7 in 0 : vector<1x128xf32>, vector<1x128xf32> -> vector<2x128xf32>
    %c0_i32 = arith.constant 0 : i32
    %9 = arith.cmpi eq, %arg1, %c0_i32 : i32
    %10 = arith.extui %9 : i1 to i32
    %c0_i32_5 = arith.constant 0 : i32
    %11 = arith.cmpi ne, %10, %c0_i32_5 : i32
    scf.if %11 {
      %c0_8 = arith.constant 0 : index
      %c0_9 = arith.constant 0 : index
      %15 = vector.load %arg4[%c0_8, %c0_9] : memref<2x128xf32, #tpu.memory_space<vmem>>, vector<2x128xf32>
      tpu.vector_store %arg4[%c0_8, %c0_9], %8 {strides = array<i32>} : memref<2x128xf32, #tpu.memory_space<vmem>>, vector<2x128xf32>,
    } else {
    }
    %c0_i32_6 = arith.constant 0 : i32
    %12 = arith.cmpi sgt, %arg1, %c0_i32_6 : i32
    %13 = arith.extui %12 : i1 to i32
    %c0_i32_7 = arith.constant 0 : i32
    %14 = arith.cmpi ne, %13, %c0_i32_7 : i32
    scf.if %14 {
      %c0_8 = arith.constant 0 : index
      %c0_9 = arith.constant 0 : index
      %15 = vector.load %arg4[%c0_8, %c0_9] : memref<2x128xf32, #tpu.memory_space<vmem>>, vector<2x128xf32>
      %16 = arith.addf %15, %8 : vector<2x128xf32>
      %c0_10 = arith.constant 0 : index
      %c0_11 = arith.constant 0 : index
      %17 = vector.load %arg4[%c0_10, %c0_11] : memref<2x128xf32, #tpu.memory_space<vmem>>, vector<2x128xf32>
      tpu.vector_store %arg4[%c0_10, %c0_11], %16 {strides = array<i32>} : memref<2x128xf32, #tpu.memory_space<vmem>>, vector<2x128xf32>,
    } else {
    }
    return
  }
  func.func @transform_0(%arg0: i32, %arg1: i32) -> (i32, i32) {
    %c0_i32 = arith.constant 0 : i32
    %c0_i32_0 = arith.constant 0 : i32
    return %arg1, %c0_i32 : i32, i32
  }
  func.func @transform_1(%arg0: i32, %arg1: i32) -> (i32, i32) {
    %c0_i32 = arith.constant 0 : i32
    %c0_i32_0 = arith.constant 0 : i32
    return %c0_i32, %arg0 : i32, i32
  }
  func.func @transform_2(%arg0: i32, %arg1: i32) -> (i32, i32) {
    %c0_i32 = arith.constant 0 : i32
    %c0_i32_0 = arith.constant 0 : i32
    return %c0_i32, %arg0 : i32, i32
  }
}

module attributes {stable_mosaic.version = 11 : i64} {
  func.func @_gemm_affine_lrelu_kernel(%arg0: i32, %arg1: i32, %arg2: memref<4x16xbf16, #tpu.memory_space<vmem>>, %arg3: memref<16x256xbf16, #tpu.memory_space<vmem>>, %arg4: memref<1x256xf32, #tpu.memory_space<vmem>>, %arg5: memref<1x256xf32, #tpu.memory_space<vmem>>, %arg6: memref<4x256xbf16, #tpu.memory_space<vmem>>) attributes {dimension_semantics = [#tpu.dimension_semantics<parallel>, #tpu.dimension_semantics<parallel>], iteration_bounds = array<i64: 1, 1>, scalar_prefetch = 0 : i64, scratch_operands = 0 : i64, tpu.core_type = #tpu.core_type<tc>, window_params = [{transform_indices = @transform_0, window_bounds = array<i64: 4, 16>}, {transform_indices = @transform_1, window_bounds = array<i64: 16, 256>}, {transform_indices = @transform_2, window_bounds = array<i64: 1, 256>}, {transform_indices = @transform_3, window_bounds = array<i64: 1, 256>}, {transform_indices = @transform_4, window_bounds = array<i64: 4, 256>}]} {
    %c0 = arith.constant 0 : index
    %c0_0 = arith.constant 0 : index
    %0 = vector.load %arg2[%c0, %c0_0] : memref<4x16xbf16, #tpu.memory_space<vmem>>, vector<4x16xbf16>
    %c0_1 = arith.constant 0 : index
    %c0_2 = arith.constant 0 : index
    %1 = vector.load %arg3[%c0_1, %c0_2] : memref<16x256xbf16, #tpu.memory_space<vmem>>, vector<16x256xbf16>
    %cst = arith.constant dense<0.000000e+00> : vector<4x256xf32>
    %2 = tpu.matmul %0, %1, %cst {dimension_numbers = #tpu.dot_dimension_numbers<[1], [0], [0], [1], [0, 0, 1, 1], [], []>} : vector<4x16xbf16>, vector<16x256xbf16>, vector<4x256xf32> -> vector<4x256xf32>
    %c0_3 = arith.constant 0 : index
    %c0_4 = arith.constant 0 : index
    %3 = vector.load %arg4[%c0_3, %c0_4] : memref<1x256xf32, #tpu.memory_space<vmem>>, vector<1x256xf32>
    %4 = vector.broadcast %3 : vector<1x256xf32> to vector<4x256xf32>
    %5 = arith.mulf %2, %4 : vector<4x256xf32>
    %c0_5 = arith.constant 0 : index
    %c0_6 = arith.constant 0 : index
    %6 = vector.load %arg5[%c0_5, %c0_6] : memref<1x256xf32, #tpu.memory_space<vmem>>, vector<1x256xf32>
    %7 = vector.broadcast %6 : vector<1x256xf32> to vector<4x256xf32>
    %8 = arith.addf %5, %7 : vector<4x256xf32>
    %cst_7 = arith.constant 0.000000e+00 : f32
    %9 = vector.broadcast %cst_7 : f32 to vector<4x256xf32>
    %10 = arith.cmpf oge, %8, %9 : vector<4x256xf32>
    %cst_8 = arith.constant 2.000000e-01 : f32
    %11 = vector.broadcast %cst_8 : f32 to vector<4x256xf32>
    %12 = arith.mulf %11, %8 : vector<4x256xf32>
    %13 = arith.select %10, %8, %12 : vector<4x256xi1>, vector<4x256xf32>
    %14 = arith.truncf %13 : vector<4x256xf32> to vector<4x256xbf16>
    %c0_9 = arith.constant 0 : index
    %c0_10 = arith.constant 0 : index
    %15 = vector.load %arg6[%c0_9, %c0_10] : memref<4x256xbf16, #tpu.memory_space<vmem>>, vector<4x256xbf16>
    tpu.vector_store %arg6[%c0_9, %c0_10], %14 {strides = array<i32>} : memref<4x256xbf16, #tpu.memory_space<vmem>>, vector<4x256xbf16>,
    return
  }
  func.func @transform_0(%arg0: i32, %arg1: i32) -> (i32, i32) {
    %c0_i32 = arith.constant 0 : i32
    %c0_i32_0 = arith.constant 0 : i32
    return %arg0, %c0_i32 : i32, i32
  }
  func.func @transform_1(%arg0: i32, %arg1: i32) -> (i32, i32) {
    %c0_i32 = arith.constant 0 : i32
    %c0_i32_0 = arith.constant 0 : i32
    return %c0_i32, %arg1 : i32, i32
  }
  func.func @transform_2(%arg0: i32, %arg1: i32) -> (i32, i32) {
    %c0_i32 = arith.constant 0 : i32
    %c0_i32_0 = arith.constant 0 : i32
    return %c0_i32, %arg1 : i32, i32
  }
  func.func @transform_3(%arg0: i32, %arg1: i32) -> (i32, i32) {
    %c0_i32 = arith.constant 0 : i32
    %c0_i32_0 = arith.constant 0 : i32
    return %c0_i32, %arg1 : i32, i32
  }
  func.func @transform_4(%arg0: i32, %arg1: i32) -> (i32, i32) {
    %c0_i32 = arith.constant 0 : i32
    return %arg0, %arg1 : i32, i32
  }
}

module attributes {stable_mosaic.version = 11 : i64} {
  func.func @_gemm_affine_lrelu_kernel(%arg0: i32, %arg1: i32, %arg2: memref<16x64xbf16, #tpu.memory_space<vmem>>, %arg3: memref<64x128xbf16, #tpu.memory_space<vmem>>, %arg4: memref<1x128xf32, #tpu.memory_space<vmem>>, %arg5: memref<1x128xf32, #tpu.memory_space<vmem>>, %arg6: memref<16x128xbf16, #tpu.memory_space<vmem>>) attributes {dimension_semantics = [#tpu.dimension_semantics<parallel>, #tpu.dimension_semantics<parallel>], iteration_bounds = array<i64: 1, 1>, scalar_prefetch = 0 : i64, scratch_operands = 0 : i64, tpu.core_type = #tpu.core_type<tc>, window_params = [{transform_indices = @transform_0, window_bounds = array<i64: 16, 64>}, {transform_indices = @transform_1, window_bounds = array<i64: 64, 128>}, {transform_indices = @transform_2, window_bounds = array<i64: 1, 128>}, {transform_indices = @transform_3, window_bounds = array<i64: 1, 128>}, {transform_indices = @transform_4, window_bounds = array<i64: 16, 128>}]} {
    %c0 = arith.constant 0 : index
    %c0_0 = arith.constant 0 : index
    %0 = vector.load %arg2[%c0, %c0_0] : memref<16x64xbf16, #tpu.memory_space<vmem>>, vector<16x64xbf16>
    %c0_1 = arith.constant 0 : index
    %c0_2 = arith.constant 0 : index
    %1 = vector.load %arg3[%c0_1, %c0_2] : memref<64x128xbf16, #tpu.memory_space<vmem>>, vector<64x128xbf16>
    %cst = arith.constant dense<0.000000e+00> : vector<16x128xf32>
    %2 = tpu.matmul %0, %1, %cst {dimension_numbers = #tpu.dot_dimension_numbers<[1], [0], [0], [1], [0, 0, 1, 1], [], []>} : vector<16x64xbf16>, vector<64x128xbf16>, vector<16x128xf32> -> vector<16x128xf32>
    %c0_3 = arith.constant 0 : index
    %c0_4 = arith.constant 0 : index
    %3 = vector.load %arg4[%c0_3, %c0_4] : memref<1x128xf32, #tpu.memory_space<vmem>>, vector<1x128xf32>
    %4 = vector.broadcast %3 : vector<1x128xf32> to vector<16x128xf32>
    %5 = arith.mulf %2, %4 : vector<16x128xf32>
    %c0_5 = arith.constant 0 : index
    %c0_6 = arith.constant 0 : index
    %6 = vector.load %arg5[%c0_5, %c0_6] : memref<1x128xf32, #tpu.memory_space<vmem>>, vector<1x128xf32>
    %7 = vector.broadcast %6 : vector<1x128xf32> to vector<16x128xf32>
    %8 = arith.addf %5, %7 : vector<16x128xf32>
    %cst_7 = arith.constant 0.000000e+00 : f32
    %9 = vector.broadcast %cst_7 : f32 to vector<16x128xf32>
    %10 = arith.cmpf oge, %8, %9 : vector<16x128xf32>
    %cst_8 = arith.constant 2.000000e-01 : f32
    %11 = vector.broadcast %cst_8 : f32 to vector<16x128xf32>
    %12 = arith.mulf %11, %8 : vector<16x128xf32>
    %13 = arith.select %10, %8, %12 : vector<16x128xi1>, vector<16x128xf32>
    %14 = arith.truncf %13 : vector<16x128xf32> to vector<16x128xbf16>
    %c0_9 = arith.constant 0 : index
    %c0_10 = arith.constant 0 : index
    %15 = vector.load %arg6[%c0_9, %c0_10] : memref<16x128xbf16, #tpu.memory_space<vmem>>, vector<16x128xbf16>
    tpu.vector_store %arg6[%c0_9, %c0_10], %14 {strides = array<i32>} : memref<16x128xbf16, #tpu.memory_space<vmem>>, vector<16x128xbf16>,
    return
  }
  func.func @transform_0(%arg0: i32, %arg1: i32) -> (i32, i32) {
    %c0_i32 = arith.constant 0 : i32
    %c0_i32_0 = arith.constant 0 : i32
    return %arg0, %c0_i32 : i32, i32
  }
  func.func @transform_1(%arg0: i32, %arg1: i32) -> (i32, i32) {
    %c0_i32 = arith.constant 0 : i32
    %c0_i32_0 = arith.constant 0 : i32
    return %c0_i32, %arg1 : i32, i32
  }
  func.func @transform_2(%arg0: i32, %arg1: i32) -> (i32, i32) {
    %c0_i32 = arith.constant 0 : i32
    %c0_i32_0 = arith.constant 0 : i32
    return %c0_i32, %arg1 : i32, i32
  }
  func.func @transform_3(%arg0: i32, %arg1: i32) -> (i32, i32) {
    %c0_i32 = arith.constant 0 : i32
    %c0_i32_0 = arith.constant 0 : i32
    return %c0_i32, %arg1 : i32, i32
  }
  func.func @transform_4(%arg0: i32, %arg1: i32) -> (i32, i32) {
    %c0_i32 = arith.constant 0 : i32
    return %arg0, %arg1 : i32, i32
  }
}

module attributes {stable_mosaic.version = 11 : i64} {
  func.func @_gemm_affine_lrelu_kernel(%arg0: i32, %arg1: i32, %arg2: memref<64x32xbf16, #tpu.memory_space<vmem>>, %arg3: memref<32x128xbf16, #tpu.memory_space<vmem>>, %arg4: memref<1x128xf32, #tpu.memory_space<vmem>>, %arg5: memref<1x128xf32, #tpu.memory_space<vmem>>, %arg6: memref<64x128xbf16, #tpu.memory_space<vmem>>) attributes {dimension_semantics = [#tpu.dimension_semantics<parallel>, #tpu.dimension_semantics<parallel>], iteration_bounds = array<i64: 1, 1>, scalar_prefetch = 0 : i64, scratch_operands = 0 : i64, tpu.core_type = #tpu.core_type<tc>, window_params = [{transform_indices = @transform_0, window_bounds = array<i64: 64, 32>}, {transform_indices = @transform_1, window_bounds = array<i64: 32, 128>}, {transform_indices = @transform_2, window_bounds = array<i64: 1, 128>}, {transform_indices = @transform_3, window_bounds = array<i64: 1, 128>}, {transform_indices = @transform_4, window_bounds = array<i64: 64, 128>}]} {
    %c0 = arith.constant 0 : index
    %c0_0 = arith.constant 0 : index
    %0 = vector.load %arg2[%c0, %c0_0] : memref<64x32xbf16, #tpu.memory_space<vmem>>, vector<64x32xbf16>
    %c0_1 = arith.constant 0 : index
    %c0_2 = arith.constant 0 : index
    %1 = vector.load %arg3[%c0_1, %c0_2] : memref<32x128xbf16, #tpu.memory_space<vmem>>, vector<32x128xbf16>
    %cst = arith.constant dense<0.000000e+00> : vector<64x128xf32>
    %2 = tpu.matmul %0, %1, %cst {dimension_numbers = #tpu.dot_dimension_numbers<[1], [0], [0], [1], [0, 0, 1, 1], [], []>} : vector<64x32xbf16>, vector<32x128xbf16>, vector<64x128xf32> -> vector<64x128xf32>
    %c0_3 = arith.constant 0 : index
    %c0_4 = arith.constant 0 : index
    %3 = vector.load %arg4[%c0_3, %c0_4] : memref<1x128xf32, #tpu.memory_space<vmem>>, vector<1x128xf32>
    %4 = vector.broadcast %3 : vector<1x128xf32> to vector<64x128xf32>
    %5 = arith.mulf %2, %4 : vector<64x128xf32>
    %c0_5 = arith.constant 0 : index
    %c0_6 = arith.constant 0 : index
    %6 = vector.load %arg5[%c0_5, %c0_6] : memref<1x128xf32, #tpu.memory_space<vmem>>, vector<1x128xf32>
    %7 = vector.broadcast %6 : vector<1x128xf32> to vector<64x128xf32>
    %8 = arith.addf %5, %7 : vector<64x128xf32>
    %cst_7 = arith.constant 0.000000e+00 : f32
    %9 = vector.broadcast %cst_7 : f32 to vector<64x128xf32>
    %10 = arith.cmpf oge, %8, %9 : vector<64x128xf32>
    %cst_8 = arith.constant 2.000000e-01 : f32
    %11 = vector.broadcast %cst_8 : f32 to vector<64x128xf32>
    %12 = arith.mulf %11, %8 : vector<64x128xf32>
    %13 = arith.select %10, %8, %12 : vector<64x128xi1>, vector<64x128xf32>
    %14 = arith.truncf %13 : vector<64x128xf32> to vector<64x128xbf16>
    %c0_9 = arith.constant 0 : index
    %c0_10 = arith.constant 0 : index
    %15 = vector.load %arg6[%c0_9, %c0_10] : memref<64x128xbf16, #tpu.memory_space<vmem>>, vector<64x128xbf16>
    tpu.vector_store %arg6[%c0_9, %c0_10], %14 {strides = array<i32>} : memref<64x128xbf16, #tpu.memory_space<vmem>>, vector<64x128xbf16>,
    return
  }
  func.func @transform_0(%arg0: i32, %arg1: i32) -> (i32, i32) {
    %c0_i32 = arith.constant 0 : i32
    %c0_i32_0 = arith.constant 0 : i32
    return %arg0, %c0_i32 : i32, i32
  }
  func.func @transform_1(%arg0: i32, %arg1: i32) -> (i32, i32) {
    %c0_i32 = arith.constant 0 : i32
    %c0_i32_0 = arith.constant 0 : i32
    return %c0_i32, %arg1 : i32, i32
  }
  func.func @transform_2(%arg0: i32, %arg1: i32) -> (i32, i32) {
    %c0_i32 = arith.constant 0 : i32
    %c0_i32_0 = arith.constant 0 : i32
    return %c0_i32, %arg1 : i32, i32
  }
  func.func @transform_3(%arg0: i32, %arg1: i32) -> (i32, i32) {
    %c0_i32 = arith.constant 0 : i32
    %c0_i32_0 = arith.constant 0 : i32
    return %c0_i32, %arg1 : i32, i32
  }
  func.func @transform_4(%arg0: i32, %arg1: i32) -> (i32, i32) {
    %c0_i32 = arith.constant 0 : i32
    return %arg0, %arg1 : i32, i32
  }
}

module attributes {stable_mosaic.version = 11 : i64} {
  func.func @_gemm_colstats_kernel(%arg0: i32, %arg1: i32, %arg2: memref<64x32xbf16, #tpu.memory_space<vmem>>, %arg3: memref<32x128xbf16, #tpu.memory_space<vmem>>, %arg4: memref<2x128xf32, #tpu.memory_space<vmem>>) attributes {dimension_semantics = [#tpu.dimension_semantics<parallel>, #tpu.dimension_semantics<arbitrary>], iteration_bounds = array<i64: 1, 1>, scalar_prefetch = 0 : i64, scratch_operands = 0 : i64, tpu.core_type = #tpu.core_type<tc>, window_params = [{transform_indices = @transform_0, window_bounds = array<i64: 64, 32>}, {transform_indices = @transform_1, window_bounds = array<i64: 32, 128>}, {transform_indices = @transform_2, window_bounds = array<i64: 2, 128>}]} {
    %c0 = arith.constant 0 : index
    %c0_0 = arith.constant 0 : index
    %0 = vector.load %arg2[%c0, %c0_0] : memref<64x32xbf16, #tpu.memory_space<vmem>>, vector<64x32xbf16>
    %c0_1 = arith.constant 0 : index
    %c0_2 = arith.constant 0 : index
    %1 = vector.load %arg3[%c0_1, %c0_2] : memref<32x128xbf16, #tpu.memory_space<vmem>>, vector<32x128xbf16>
    %cst = arith.constant dense<0.000000e+00> : vector<64x128xf32>
    %2 = tpu.matmul %0, %1, %cst {dimension_numbers = #tpu.dot_dimension_numbers<[1], [0], [0], [1], [0, 0, 1, 1], [], []>} : vector<64x32xbf16>, vector<32x128xbf16>, vector<64x128xf32> -> vector<64x128xf32>
    %cst_3 = arith.constant dense<0.000000e+00> : vector<128xf32>
    %3 = vector.multi_reduction <add>, %2, %cst_3 [0] : vector<64x128xf32> to vector<128xf32>
    %4 = vector.shape_cast %3 : vector<128xf32> to vector<1x128xf32>
    %5 = arith.mulf %2, %2 : vector<64x128xf32>
    %cst_4 = arith.constant dense<0.000000e+00> : vector<128xf32>
    %6 = vector.multi_reduction <add>, %5, %cst_4 [0] : vector<64x128xf32> to vector<128xf32>
    %7 = vector.shape_cast %6 : vector<128xf32> to vector<1x128xf32>
    %8 = tpu.concatenate %4, %7 in 0 : vector<1x128xf32>, vector<1x128xf32> -> vector<2x128xf32>
    %c0_i32 = arith.constant 0 : i32
    %9 = arith.cmpi eq, %arg1, %c0_i32 : i32
    %10 = arith.extui %9 : i1 to i32
    %c0_i32_5 = arith.constant 0 : i32
    %11 = arith.cmpi ne, %10, %c0_i32_5 : i32
    scf.if %11 {
      %c0_8 = arith.constant 0 : index
      %c0_9 = arith.constant 0 : index
      %15 = vector.load %arg4[%c0_8, %c0_9] : memref<2x128xf32, #tpu.memory_space<vmem>>, vector<2x128xf32>
      tpu.vector_store %arg4[%c0_8, %c0_9], %8 {strides = array<i32>} : memref<2x128xf32, #tpu.memory_space<vmem>>, vector<2x128xf32>,
    } else {
    }
    %c0_i32_6 = arith.constant 0 : i32
    %12 = arith.cmpi sgt, %arg1, %c0_i32_6 : i32
    %13 = arith.extui %12 : i1 to i32
    %c0_i32_7 = arith.constant 0 : i32
    %14 = arith.cmpi ne, %13, %c0_i32_7 : i32
    scf.if %14 {
      %c0_8 = arith.constant 0 : index
      %c0_9 = arith.constant 0 : index
      %15 = vector.load %arg4[%c0_8, %c0_9] : memref<2x128xf32, #tpu.memory_space<vmem>>, vector<2x128xf32>
      %16 = arith.addf %15, %8 : vector<2x128xf32>
      %c0_10 = arith.constant 0 : index
      %c0_11 = arith.constant 0 : index
      %17 = vector.load %arg4[%c0_10, %c0_11] : memref<2x128xf32, #tpu.memory_space<vmem>>, vector<2x128xf32>
      tpu.vector_store %arg4[%c0_10, %c0_11], %16 {strides = array<i32>} : memref<2x128xf32, #tpu.memory_space<vmem>>, vector<2x128xf32>,
    } else {
    }
    return
  }
  func.func @transform_0(%arg0: i32, %arg1: i32) -> (i32, i32) {
    %c0_i32 = arith.constant 0 : i32
    %c0_i32_0 = arith.constant 0 : i32
    return %arg1, %c0_i32 : i32, i32
  }
  func.func @transform_1(%arg0: i32, %arg1: i32) -> (i32, i32) {
    %c0_i32 = arith.constant 0 : i32
    %c0_i32_0 = arith.constant 0 : i32
    return %c0_i32, %arg0 : i32, i32
  }
  func.func @transform_2(%arg0: i32, %arg1: i32) -> (i32, i32) {
    %c0_i32 = arith.constant 0 : i32
    %c0_i32_0 = arith.constant 0 : i32
    return %c0_i32, %arg0 : i32, i32
  }
}

module attributes {stable_mosaic.version = 11 : i64} {
  func.func @_gemm_colstats_kernel(%arg0: i32, %arg1: i32, %arg2: memref<128x16xbf16, #tpu.memory_space<vmem>>, %arg3: memref<16x128xbf16, #tpu.memory_space<vmem>>, %arg4: memref<2x128xf32, #tpu.memory_space<vmem>>) attributes {dimension_semantics = [#tpu.dimension_semantics<parallel>, #tpu.dimension_semantics<arbitrary>], iteration_bounds = array<i64: 1, 2>, scalar_prefetch = 0 : i64, scratch_operands = 0 : i64, tpu.core_type = #tpu.core_type<tc>, window_params = [{transform_indices = @transform_0, window_bounds = array<i64: 128, 16>}, {transform_indices = @transform_1, window_bounds = array<i64: 16, 128>}, {transform_indices = @transform_2, window_bounds = array<i64: 2, 128>}]} {
    %c0 = arith.constant 0 : index
    %c0_0 = arith.constant 0 : index
    %0 = vector.load %arg2[%c0, %c0_0] : memref<128x16xbf16, #tpu.memory_space<vmem>>, vector<128x16xbf16>
    %c0_1 = arith.constant 0 : index
    %c0_2 = arith.constant 0 : index
    %1 = vector.load %arg3[%c0_1, %c0_2] : memref<16x128xbf16, #tpu.memory_space<vmem>>, vector<16x128xbf16>
    %cst = arith.constant dense<0.000000e+00> : vector<128x128xf32>
    %2 = tpu.matmul %0, %1, %cst {dimension_numbers = #tpu.dot_dimension_numbers<[1], [0], [0], [1], [0, 0, 1, 1], [], []>} : vector<128x16xbf16>, vector<16x128xbf16>, vector<128x128xf32> -> vector<128x128xf32>
    %cst_3 = arith.constant dense<0.000000e+00> : vector<128xf32>
    %3 = vector.multi_reduction <add>, %2, %cst_3 [0] : vector<128x128xf32> to vector<128xf32>
    %4 = vector.shape_cast %3 : vector<128xf32> to vector<1x128xf32>
    %5 = arith.mulf %2, %2 : vector<128x128xf32>
    %cst_4 = arith.constant dense<0.000000e+00> : vector<128xf32>
    %6 = vector.multi_reduction <add>, %5, %cst_4 [0] : vector<128x128xf32> to vector<128xf32>
    %7 = vector.shape_cast %6 : vector<128xf32> to vector<1x128xf32>
    %8 = tpu.concatenate %4, %7 in 0 : vector<1x128xf32>, vector<1x128xf32> -> vector<2x128xf32>
    %c0_i32 = arith.constant 0 : i32
    %9 = arith.cmpi eq, %arg1, %c0_i32 : i32
    %10 = arith.extui %9 : i1 to i32
    %c0_i32_5 = arith.constant 0 : i32
    %11 = arith.cmpi ne, %10, %c0_i32_5 : i32
    scf.if %11 {
      %c0_8 = arith.constant 0 : index
      %c0_9 = arith.constant 0 : index
      %15 = vector.load %arg4[%c0_8, %c0_9] : memref<2x128xf32, #tpu.memory_space<vmem>>, vector<2x128xf32>
      tpu.vector_store %arg4[%c0_8, %c0_9], %8 {strides = array<i32>} : memref<2x128xf32, #tpu.memory_space<vmem>>, vector<2x128xf32>,
    } else {
    }
    %c0_i32_6 = arith.constant 0 : i32
    %12 = arith.cmpi sgt, %arg1, %c0_i32_6 : i32
    %13 = arith.extui %12 : i1 to i32
    %c0_i32_7 = arith.constant 0 : i32
    %14 = arith.cmpi ne, %13, %c0_i32_7 : i32
    scf.if %14 {
      %c0_8 = arith.constant 0 : index
      %c0_9 = arith.constant 0 : index
      %15 = vector.load %arg4[%c0_8, %c0_9] : memref<2x128xf32, #tpu.memory_space<vmem>>, vector<2x128xf32>
      %16 = arith.addf %15, %8 : vector<2x128xf32>
      %c0_10 = arith.constant 0 : index
      %c0_11 = arith.constant 0 : index
      %17 = vector.load %arg4[%c0_10, %c0_11] : memref<2x128xf32, #tpu.memory_space<vmem>>, vector<2x128xf32>
      tpu.vector_store %arg4[%c0_10, %c0_11], %16 {strides = array<i32>} : memref<2x128xf32, #tpu.memory_space<vmem>>, vector<2x128xf32>,
    } else {
    }
    return
  }
  func.func @transform_0(%arg0: i32, %arg1: i32) -> (i32, i32) {
    %c0_i32 = arith.constant 0 : i32
    %c0_i32_0 = arith.constant 0 : i32
    return %arg1, %c0_i32 : i32, i32
  }
  func.func @transform_1(%arg0: i32, %arg1: i32) -> (i32, i32) {
    %c0_i32 = arith.constant 0 : i32
    %c0_i32_0 = arith.constant 0 : i32
    return %c0_i32, %arg0 : i32, i32
  }
  func.func @transform_2(%arg0: i32, %arg1: i32) -> (i32, i32) {
    %c0_i32 = arith.constant 0 : i32
    %c0_i32_0 = arith.constant 0 : i32
    return %c0_i32, %arg0 : i32, i32
  }
}

module attributes {stable_mosaic.version = 11 : i64} {
  func.func @_gemm_affine_lrelu_kernel(%arg0: i32, %arg1: i32, %arg2: memref<128x16xbf16, #tpu.memory_space<vmem>>, %arg3: memref<16x128xbf16, #tpu.memory_space<vmem>>, %arg4: memref<1x128xf32, #tpu.memory_space<vmem>>, %arg5: memref<1x128xf32, #tpu.memory_space<vmem>>, %arg6: memref<128x128xbf16, #tpu.memory_space<vmem>>) attributes {dimension_semantics = [#tpu.dimension_semantics<parallel>, #tpu.dimension_semantics<parallel>], iteration_bounds = array<i64: 2, 1>, scalar_prefetch = 0 : i64, scratch_operands = 0 : i64, tpu.core_type = #tpu.core_type<tc>, window_params = [{transform_indices = @transform_0, window_bounds = array<i64: 128, 16>}, {transform_indices = @transform_1, window_bounds = array<i64: 16, 128>}, {transform_indices = @transform_2, window_bounds = array<i64: 1, 128>}, {transform_indices = @transform_3, window_bounds = array<i64: 1, 128>}, {transform_indices = @transform_4, window_bounds = array<i64: 128, 128>}]} {
    %c0 = arith.constant 0 : index
    %c0_0 = arith.constant 0 : index
    %0 = vector.load %arg2[%c0, %c0_0] : memref<128x16xbf16, #tpu.memory_space<vmem>>, vector<128x16xbf16>
    %c0_1 = arith.constant 0 : index
    %c0_2 = arith.constant 0 : index
    %1 = vector.load %arg3[%c0_1, %c0_2] : memref<16x128xbf16, #tpu.memory_space<vmem>>, vector<16x128xbf16>
    %cst = arith.constant dense<0.000000e+00> : vector<128x128xf32>
    %2 = tpu.matmul %0, %1, %cst {dimension_numbers = #tpu.dot_dimension_numbers<[1], [0], [0], [1], [0, 0, 1, 1], [], []>} : vector<128x16xbf16>, vector<16x128xbf16>, vector<128x128xf32> -> vector<128x128xf32>
    %c0_3 = arith.constant 0 : index
    %c0_4 = arith.constant 0 : index
    %3 = vector.load %arg4[%c0_3, %c0_4] : memref<1x128xf32, #tpu.memory_space<vmem>>, vector<1x128xf32>
    %4 = vector.broadcast %3 : vector<1x128xf32> to vector<128x128xf32>
    %5 = arith.mulf %2, %4 : vector<128x128xf32>
    %c0_5 = arith.constant 0 : index
    %c0_6 = arith.constant 0 : index
    %6 = vector.load %arg5[%c0_5, %c0_6] : memref<1x128xf32, #tpu.memory_space<vmem>>, vector<1x128xf32>
    %7 = vector.broadcast %6 : vector<1x128xf32> to vector<128x128xf32>
    %8 = arith.addf %5, %7 : vector<128x128xf32>
    %cst_7 = arith.constant 0.000000e+00 : f32
    %9 = vector.broadcast %cst_7 : f32 to vector<128x128xf32>
    %10 = arith.cmpf oge, %8, %9 : vector<128x128xf32>
    %cst_8 = arith.constant 2.000000e-01 : f32
    %11 = vector.broadcast %cst_8 : f32 to vector<128x128xf32>
    %12 = arith.mulf %11, %8 : vector<128x128xf32>
    %13 = arith.select %10, %8, %12 : vector<128x128xi1>, vector<128x128xf32>
    %14 = arith.truncf %13 : vector<128x128xf32> to vector<128x128xbf16>
    %c0_9 = arith.constant 0 : index
    %c0_10 = arith.constant 0 : index
    %15 = vector.load %arg6[%c0_9, %c0_10] : memref<128x128xbf16, #tpu.memory_space<vmem>>, vector<128x128xbf16>
    tpu.vector_store %arg6[%c0_9, %c0_10], %14 {strides = array<i32>} : memref<128x128xbf16, #tpu.memory_space<vmem>>, vector<128x128xbf16>,
    return
  }
  func.func @transform_0(%arg0: i32, %arg1: i32) -> (i32, i32) {
    %c0_i32 = arith.constant 0 : i32
    %c0_i32_0 = arith.constant 0 : i32
    return %arg0, %c0_i32 : i32, i32
  }
  func.func @transform_1(%arg0: i32, %arg1: i32) -> (i32, i32) {
    %c0_i32 = arith.constant 0 : i32
    %c0_i32_0 = arith.constant 0 : i32
    return %c0_i32, %arg1 : i32, i32
  }
  func.func @transform_2(%arg0: i32, %arg1: i32) -> (i32, i32) {
    %c0_i32 = arith.constant 0 : i32
    %c0_i32_0 = arith.constant 0 : i32
    return %c0_i32, %arg1 : i32, i32
  }
  func.func @transform_3(%arg0: i32, %arg1: i32) -> (i32, i32) {
    %c0_i32 = arith.constant 0 : i32
    %c0_i32_0 = arith.constant 0 : i32
    return %c0_i32, %arg1 : i32, i32
  }
  func.func @transform_4(%arg0: i32, %arg1: i32) -> (i32, i32) {
    %c0_i32 = arith.constant 0 : i32
    return %arg0, %arg1 : i32, i32
  }
}

module attributes {stable_mosaic.version = 11 : i64} {
  func.func @_gemm_bias_tanh_kernel(%arg0: i32, %arg1: i32, %arg2: memref<128x8xbf16, #tpu.memory_space<vmem>>, %arg3: memref<8x128xbf16, #tpu.memory_space<vmem>>, %arg4: memref<1x128xf32, #tpu.memory_space<vmem>>, %arg5: memref<128x128xbf16, #tpu.memory_space<vmem>>) attributes {dimension_semantics = [#tpu.dimension_semantics<parallel>, #tpu.dimension_semantics<parallel>], iteration_bounds = array<i64: 8, 1>, scalar_prefetch = 0 : i64, scratch_operands = 0 : i64, tpu.core_type = #tpu.core_type<tc>, window_params = [{transform_indices = @transform_0, window_bounds = array<i64: 128, 8>}, {transform_indices = @transform_1, window_bounds = array<i64: 8, 128>}, {transform_indices = @transform_2, window_bounds = array<i64: 1, 128>}, {transform_indices = @transform_3, window_bounds = array<i64: 128, 128>}]} {
    %c0 = arith.constant 0 : index
    %c0_0 = arith.constant 0 : index
    %0 = vector.load %arg2[%c0, %c0_0] : memref<128x8xbf16, #tpu.memory_space<vmem>>, vector<128x8xbf16>
    %c0_1 = arith.constant 0 : index
    %c0_2 = arith.constant 0 : index
    %1 = vector.load %arg3[%c0_1, %c0_2] : memref<8x128xbf16, #tpu.memory_space<vmem>>, vector<8x128xbf16>
    %cst = arith.constant dense<0.000000e+00> : vector<128x128xf32>
    %2 = tpu.matmul %0, %1, %cst {dimension_numbers = #tpu.dot_dimension_numbers<[1], [0], [0], [1], [0, 0, 1, 1], [], []>} : vector<128x8xbf16>, vector<8x128xbf16>, vector<128x128xf32> -> vector<128x128xf32>
    %c0_3 = arith.constant 0 : index
    %c0_4 = arith.constant 0 : index
    %3 = vector.load %arg4[%c0_3, %c0_4] : memref<1x128xf32, #tpu.memory_space<vmem>>, vector<1x128xf32>
    %4 = vector.broadcast %3 : vector<1x128xf32> to vector<128x128xf32>
    %5 = arith.addf %2, %4 : vector<128x128xf32>
    %6 = math.tanh %5 : vector<128x128xf32>
    %7 = arith.truncf %6 : vector<128x128xf32> to vector<128x128xbf16>
    %c0_5 = arith.constant 0 : index
    %c0_6 = arith.constant 0 : index
    %8 = vector.load %arg5[%c0_5, %c0_6] : memref<128x128xbf16, #tpu.memory_space<vmem>>, vector<128x128xbf16>
    tpu.vector_store %arg5[%c0_5, %c0_6], %7 {strides = array<i32>} : memref<128x128xbf16, #tpu.memory_space<vmem>>, vector<128x128xbf16>,
    return
  }
  func.func @transform_0(%arg0: i32, %arg1: i32) -> (i32, i32) {
    %c0_i32 = arith.constant 0 : i32
    %c0_i32_0 = arith.constant 0 : i32
    return %arg0, %c0_i32 : i32, i32
  }
  func.func @transform_1(%arg0: i32, %arg1: i32) -> (i32, i32) {
    %c0_i32 = arith.constant 0 : i32
    %c0_i32_0 = arith.constant 0 : i32
    return %c0_i32, %arg1 : i32, i32
  }
  func.func @transform_2(%arg0: i32, %arg1: i32) -> (i32, i32) {
    %c0_i32 = arith.constant 0 : i32
    %c0_i32_0 = arith.constant 0 : i32
    return %c0_i32, %arg1 : i32, i32
  }
  func.func @transform_3(%arg0: i32, %arg1: i32) -> (i32, i32) {
    %c0_i32 = arith.constant 0 : i32
    return %arg0, %arg1 : i32, i32
  }
}

</mosaic_0001>

<bundles_post_ra>
// kernel: tile.48
= control target key start
LH: loop header
LB: loop body
LE: loop exit
PB: predicated region body
PF: predicated region fallthrough
CT: control target
= control target key end

     0   :  { %s22_s0 = inlined_call_operand.vmem [shape: f32[64], index: 0, kind: input, shape index: {}]   ;;  %s23_s1 = inlined_call_operand.vmem [shape: f32[4,64], index: 1, kind: output, shape index: {}]  }
   0x1   :  { %v4_v0 = vld [vmem:[%s22_s0] ss:$0 sm:$0xff] }
   0x2   :  { %5 = vst [vmem:[%s23_s1] sm:$0xf] %v4_v0 }

// kernel: tile.58
= control target key start
LH: loop header
LB: loop body
LE: loop exit
PB: predicated region body
PF: predicated region fallthrough
CT: control target
= control target key end

     0   :  { %s22_s0 = inlined_call_operand.vmem [shape: f32[32], index: 0, kind: input, shape index: {}]   ;;  %s23_s1 = inlined_call_operand.vmem [shape: f32[4,32], index: 1, kind: output, shape index: {}]  }
   0x1   :  { %v4_v0 = vld [vmem:[%s22_s0] ss:$0 sm:$0xff] }
   0x2   :  { %5 = vst [vmem:[%s23_s1] sm:$0xf] %v4_v0 }

// kernel: generator_forward.9
= control target key start
LH: loop header
LB: loop body
LE: loop exit
PB: predicated region body
PF: predicated region fallthrough
CT: control target
= control target key end

     0   :  { %7 = vsyncpa [#allocation3], 0  ;;  %s192_s9 = smov [#allocation2]   ;;  %s229_s0 = inlined_call_operand.vmem [shape: bf16[4,16], index: 0, kind: input, shape index: {}]   ;;  %s230_s1 = inlined_call_operand.hbm [shape: bf16[16,256], index: 1, kind: input, shape index: {}]   ;;  %s231_s2 = inlined_call_operand.vmem [shape: f32[2,256], index: 2, kind: output, shape index: {}]  }
   0x1   :  { %s15_s10 = sshll.u32 %s192_s9, 4  ;;  %s168_s13 = scalar_lea.hbm %s230_s1, 256  ;;  %s16_s10 = int_to_ptr.vmem [resolvable:$true] %s15_s10 }
   0x2   :  { %p169_p0 = scmp.ne.s32.totalorder %s230_s1, %s168_s13  ;;  %p172_p1 = scmp.lt.u32.totalorder %s168_s13, %s230_s1 }
   0x4   :  { %p174_p2 = pnand %p172_p1, %p169_p0 }
   0x6   :  { %177 = shalt.err (!%p174_p2)
}
   0x7   :  { %s178_s18 = scalar_lea.vmem %s16_s10, 256  ;;  %p183_p4 = scmp.lt.s32.totalorder %s16_s10, %s16_s10 }
   0x8   :  { %p179_p3 = scmp.ne.s32.totalorder %s16_s10, %s178_s18  ;;  %p184_p5 = scmp.lt.s32.totalorder %s178_s18, %s178_s18 }
   0xa   :  { %p185_p6 = por %p184_p5, %p183_p4 }
   0xc   :  { %p186_p7 = pnand %p185_p6, %p179_p3 }
   0xe   :  { %189 = shalt.err (!%p186_p7)
}
   0xf   :  { %s193_s19 = smov 128   ;;  %s194_s20 = smov 8  }
  0x10   :  { %21 = dma.hbm_to_vmem [thread:$0]  %s230_s1, 256, %s16_s10, [#allocation3], %s193_s19, %s193_s19, %s194_s20  }
  0x11   :  { %190 = dma.done.wait [#allocation3], 256  }
  0x12   :  { %191 = vsyncadd [#allocation3], 4294967040  ;;  %v195_v0 = vmov 0   ;;  %v165_v1 = vld [vmem:[#allocation2 + $0x4] ss:$8 sps:$4 sm:$0xff]   ;;  %vm39_vm0 = vcmask 130048  }
  0x13   :  { %75 = vmatprep.mubr.bf16.mxu0 %v195_v0  ;;  %v167_v2 = vld [vmem:[#allocation2] ss:$8 sps:$4 sm:$0xff]   ;;  %43 = vmatprep.subr.bf16.mxu0 %v165_v1  ;;  %vm84_vm1 = vcmask 1043456   ;;  %vm115_vm2 = vcmask 1040384  }
  0x14   :  { %44 = vmatpush1.bf16.msra.mxu0 %v167_v2  ;;  %v26_v3 = vld [vmem:[%s229_s0] sm:$0x3] }
  0x17   :  { %159 = vmatmul.mubr.msk.bf16.vlgmr.msra.gmra.mrb[0].mxu0 %vm39_vm0, %v26_v3 }
  0xea   :  { %v77_v4 = vpop.f32.mrb[0].mxu0 }
  0xeb   :  { %v85_v5 = vsel %vm84_vm1, %v77_v4, 0.0  ;;  %v99_v6 = vmul.f32 %v77_v4, %v77_v4  ;;  %v79_v7 = vpop.f32.mrb[1].mxu0 }
  0xec   :  { %v86_v8 = vrot.slane %v85_v5, 4  ;;  %v92_v9 = vsel %vm84_vm1, %v79_v7, 0.0  ;;  %v100_v10 = vmul.f32 %v79_v7, %v79_v7  ;;  %v81_v11 = vpop.f32.mrb[2].mxu0 }
  0xed   :  { %v101_v12 = vsel %vm84_vm1, %v99_v6, 0.0  ;;  %v93_v13 = vrot.slane %v92_v9, 4  ;;  %v82_v14 = vpop.f32.mrb[3].mxu0 }
  0xee   :  { %v87_v15 = vadd.f32 %v86_v8, %v85_v5  ;;  %v102_v16 = vrot.slane %v101_v12, 4  ;;  %v108_v17 = vsel %vm84_vm1, %v100_v10, 0.0 }
  0xef   :  { %v94_v18 = vadd.f32 %v93_v13, %v92_v9  ;;  %v109_v19 = vrot.slane %v108_v17, 4 }
  0xf0   :  { %v88_v20 = vrot.slane %v87_v15, 2  ;;  %v103_v21 = vadd.f32 %v102_v16, %v101_v12 }
  0xf1   :  { %v95_v22 = vrot.slane %v94_v18, 2  ;;  %v110_v23 = vadd.f32 %v109_v19, %v108_v17 }
  0xf2   :  { %v89_v24 = vadd.f32 %v88_v20, %v87_v15  ;;  %v104_v25 = vrot.slane %v103_v21, 2 }
  0xf3   :  { %v96_v26 = vadd.f32 %v95_v22, %v94_v18  ;;  %v111_v27 = vrot.slane %v110_v23, 2 }
  0xf4   :  { %v90_v28 = vrot.slane %v89_v24, 1  ;;  %v105_v29 = vadd.f32 %v104_v25, %v103_v21 }
  0xf5   :  { %v97_v30 = vrot.slane %v96_v26, 1  ;;  %v112_v31 = vadd.f32 %v111_v27, %v110_v23 }
  0xf6   :  { %v106_v32 = vrot.slane %v105_v29, 1  ;;  %v91_v34 = vadd.f32 %v90_v28, %v89_v24 }
  0xf7   :  { %v113_v33 = vrot.slane %v112_v31, 1  ;;  %v98_v36 = vadd.f32 %v97_v30, %v96_v26 }
  0xf8   :  { %v107_v35 = vadd.f32 %v106_v32, %v105_v29 }
  0xf9   :  { %v114_v37 = vadd.f32 %v113_v33, %v112_v31 }
  0xfa   :  { %v116_v38 = vsel %vm115_vm2, %v91_v34, %v107_v35 }
  0xfb   :  { %v117_v39 = vsel %vm115_vm2, %v98_v36, %v114_v37 }
  0xfc   :  { %v124_v40 = vcombine.low %v116_v38, %v117_v39 }
  0xfe   :  { %160 = vst.sshfl [vmem:[%s231_s2] sm:$0x33 pattern:$0x76325410] %v124_v40 }
  0xff   :  { %156 = vsyncpa [#allocation3], 1 }

// kernel: generator_forward.11
= control target key start
LH: loop header
LB: loop body
LE: loop exit
PB: predicated region body
PF: predicated region fallthrough
CT: control target
= control target key end

     0   :  { %7 = vsyncpa [#allocation3], 0  ;;  %s202_s9 = smov [#allocation2]   ;;  %s240_s0 = inlined_call_operand.vmem [shape: bf16[16,64], index: 0, kind: input, shape index: {}]   ;;  %s241_s1 = inlined_call_operand.hbm [shape: bf16[64,128], index: 1, kind: input, shape index: {}]   ;;  %s242_s2 = inlined_call_operand.vmem [shape: f32[2,128], index: 2, kind: output, shape index: {}]  }
   0x1   :  { %s15_s10 = sshll.u32 %s202_s9, 4  ;;  %s178_s13 = scalar_lea.hbm %s241_s1, 512  ;;  %s16_s10 = int_to_ptr.vmem [resolvable:$true] %s15_s10 }
   0x2   :  { %p179_p0 = scmp.ne.s32.totalorder %s241_s1, %s178_s13  ;;  %p182_p1 = scmp.lt.u32.totalorder %s178_s13, %s241_s1 }
   0x4   :  { %p184_p2 = pnand %p182_p1, %p179_p0 }
   0x6   :  { %187 = shalt.err (!%p184_p2)
}
   0x7   :  { %s188_s18 = scalar_lea.vmem %s16_s10, 512  ;;  %p193_p4 = scmp.lt.s32.totalorder %s16_s10, %s16_s10 }
   0x8   :  { %p189_p3 = scmp.ne.s32.totalorder %s16_s10, %s188_s18  ;;  %p194_p5 = scmp.lt.s32.totalorder %s188_s18, %s188_s18 }
   0xa   :  { %p195_p6 = por %p194_p5, %p193_p4 }
   0xc   :  { %p196_p7 = pnand %p195_p6, %p189_p3 }
   0xe   :  { %199 = shalt.err (!%p196_p7)
}
   0xf   :  { %s203_s19 = smov 64   ;;  %s204_s20 = smov 4  }
  0x10   :  { %21 = dma.hbm_to_vmem [thread:$0]  %s241_s1, 512, %s16_s10, [#allocation3], %s203_s19, %s203_s19, %s204_s20  }
  0x11   :  { %200 = dma.done.wait [#allocation3], 512  }
  0x12   :  { %201 = vsyncadd [#allocation3], 4294966784  ;;  %v205_v0 = vmov 0.0   ;;  %vm206_vm0 = vmmov 0   ;;  %v173_v1 = vld [vmem:[#allocation2] sm:$0xff]   ;;  %v174_v2 = vld [vmem:[#allocation2 + $0x8] sm:$0xff]  }
  0x13   :  { %156 = vmatprep.subr.bf16.mxu0 %v205_v0  ;;  %164 = vmatprep.mubr.msk.bf16.mxu0 %vm206_vm0, %v205_v0  ;;  %v175_v3 = vld [vmem:[#allocation2 + $0x10] sm:$0xff]   ;;  %v176_v4 = vld [vmem:[#allocation2 + $0x18] sm:$0xff]   ;;  %v177_v5 = vld [vmem:[%s240_s0] sm:$0xff]   ;;  %vm65_vm1 = vcmask 523264   ;;  %vm126_vm2 = vcmask 1040384  }
  0x14   :  { %157 = vmatpush3.bf16.msra.mxu0 %v173_v1 }
  0x15   :  { %158 = vmatprep.subr.bf16.mxu0 %v205_v0 }
  0x18   :  { %159 = vmatpush3.bf16.msra.mxu0 %v174_v2 }
  0x19   :  { %160 = vmatprep.subr.bf16.mxu0 %v205_v0 }
  0x1c   :  { %161 = vmatpush3.bf16.msra.mxu0 %v175_v3 }
  0x1d   :  { %162 = vmatprep.subr.bf16.mxu0 %v205_v0 }
  0x20   :  { %163 = vmatpush3.bf16.msra.mxu0 %v176_v4 }
  0x23   :  { %165 = vmatmul.mubr.msk.bf16.vlgmr.msra.gmra.mrb[0].mxu0 %vm65_vm1, %v177_v5 }
  0xf6   :  { %v103_v6 = vpop.f32.mrb[0].mxu0 }
  0xf7   :  { %v166_v7 = vpop.f32.mrb[1].mxu0  ;;  %v117_v9 = vmul.f32 %v103_v6, %v103_v6 }
  0xf8   :  { %v106_v8 = vpop.f32.mrb[2].mxu0 }
  0xf9   :  { %v110_v10 = vadd.f32 %v106_v8, %v103_v6  ;;  %v118_v11 = vmul.f32 %v106_v8, %v106_v8  ;;  %v167_v12 = vpop.f32.mrb[3].mxu0 }
  0xfb   :  { %v111_v13 = vrot.slane %v110_v10, 4  ;;  %v119_v14 = vadd.f32 %v118_v11, %v117_v9 }
  0xfd   :  { %v112_v15 = vadd.f32 %v111_v13, %v110_v10  ;;  %v120_v16 = vrot.slane %v119_v14, 4 }
  0xff   :  { %v113_v17 = vrot.slane %v112_v15, 2  ;;  %v121_v18 = vadd.f32 %v120_v16, %v119_v14 }
 0x101   :  { %v114_v19 = vadd.f32 %v113_v17, %v112_v15  ;;  %v122_v20 = vrot.slane %v121_v18, 2 }
 0x103   :  { %v115_v21 = vrot.slane %v114_v19, 1  ;;  %v123_v22 = vadd.f32 %v122_v20, %v121_v18 }
 0x105   :  { %v124_v23 = vrot.slane %v123_v22, 1  ;;  %v116_v24 = vadd.f32 %v115_v21, %v114_v19 }
 0x107   :  { %v125_v25 = vadd.f32 %v124_v23, %v123_v22 }
 0x109   :  { %v127_v26 = vsel %vm126_vm2, %v116_v24, %v125_v25 }
 0x10a   :  { %132 = vst [vmem:[%s242_s2] sm:$0x3] %v127_v26 }
 0x10b   :  { %144 = vsyncpa [#allocation3], 1 }

// kernel: generator_forward.10
= control target key start
LH: loop header
LB: loop body
LE: loop exit
PB: predicated region body
PF: predicated region fallthrough
CT: control target
= control target key end

     0   :  { %9 = vsyncpa [#allocation3], 0  ;;  %s179_s15 = smov [#allocation2]   ;;  %s232_s0 = inlined_call_operand.vmem [shape: bf16[4,16], index: 0, kind: input, shape index: {}]   ;;  %s233_s1 = inlined_call_operand.hbm [shape: bf16[16,256], index: 1, kind: input, shape index: {}]   ;;  %s234_s2 = inlined_call_operand.vmem [shape: f32[1,256], index: 2, kind: input, shape index: {}]   ;;  %s235_s3 = inlined_call_operand.vmem [shape: f32[1,256], index: 3, kind: input, shape index: {}]   ;;  %s236_s4 = inlined_call_operand.vmem [shape: bf16[4,256], index: 4, kind: output, shape index: {}]  }
   0x1   :  { %s17_s16 = sshll.u32 %s179_s15, 4  ;;  %s155_s19 = scalar_lea.hbm %s233_s1, 256  ;;  %s18_s16 = int_to_ptr.vmem [resolvable:$true] %s17_s16 }
   0x2   :  { %p156_p0 = scmp.ne.s32.totalorder %s233_s1, %s155_s19  ;;  %p159_p1 = scmp.lt.u32.totalorder %s155_s19, %s233_s1 }
   0x4   :  { %p161_p2 = pnand %p159_p1, %p156_p0 }
   0x6   :  { %164 = shalt.err (!%p161_p2)
}
   0x7   :  { %s165_s24 = scalar_lea.vmem %s18_s16, 256  ;;  %p170_p4 = scmp.lt.s32.totalorder %s18_s16, %s18_s16 }
   0x8   :  { %p166_p3 = scmp.ne.s32.totalorder %s18_s16, %s165_s24  ;;  %p171_p5 = scmp.lt.s32.totalorder %s165_s24, %s165_s24 }
   0xa   :  { %p172_p6 = por %p171_p5, %p170_p4 }
   0xc   :  { %p173_p7 = pnand %p172_p6, %p166_p3 }
   0xe   :  { %176 = shalt.err (!%p173_p7)
}
   0xf   :  { %s180_s25 = smov 128   ;;  %s181_s26 = smov 8  }
  0x10   :  { %23 = dma.hbm_to_vmem [thread:$0]  %s233_s1, 256, %s18_s16, [#allocation3], %s180_s25, %s180_s25, %s181_s26  }
  0x11   :  { %177 = dma.done.wait [#allocation3], 256  }
  0x12   :  { %178 = vsyncadd [#allocation3], 4294967040  ;;  %v182_v0 = vmov 0   ;;  %v152_v1 = vld [vmem:[#allocation2 + $0x4] ss:$8 sps:$4 sm:$0xff]   ;;  %vm45_vm0 = vcmask 130048   ;;  %v92_v4 = vlaneseq }
  0x13   :  { %81 = vmatprep.mubr.bf16.mxu0 %v182_v0  ;;  %v154_v2 = vld [vmem:[#allocation2] ss:$8 sps:$4 sm:$0xff]   ;;  %49 = vmatprep.subr.bf16.mxu0 %v152_v1 }
  0x14   :  { %50 = vmatpush1.bf16.msra.mxu0 %v154_v2  ;;  %v32_v3 = vld [vmem:[%s232_s0] sm:$0x3]  ;;  %v93_v5 = vshrl.u32 %v92_v4, 7 }
  0x15   :  { %v90_v7 = vld [vmem:[%s234_s2] sm:$0x3] }
  0x16   :  { %v94_v6 = vsub.s32 0, %v93_v5  ;;  %v98_v8 = vsub.s32 1, %v93_v5  ;;  %v104_v9 = vld [vmem:[%s235_s3] sm:$0x3] }
  0x17   :  { %145 = vmatmul.mubr.msk.bf16.vlgmr.msra.gmra.mrb[0].mxu0 %vm45_vm0, %v32_v3 }
  0x18   :  { %v95_v10 = vrot.slane %v90_v7, %v94_v6  ;;  %v99_v11 = vrot.slane %v90_v7, %v98_v8  ;;  %v109_v12 = vrot.slane %v104_v9, %v94_v6  ;;  %v113_v14 = vrot.slane %v104_v9, %v98_v8 }
  0xea   :  { %v83_v13 = vpop.f32.mrb[0].mxu0 }
  0xeb   :  { %v102_v15 = vmul.f32 %v95_v10, %v83_v13  ;;  %v85_v16 = vpop.f32.mrb[1].mxu0 }
  0xec   :  { %v103_v17 = vmul.f32 %v99_v11, %v85_v16  ;;  %v87_v18 = vpop.f32.mrb[2].mxu0 }
  0xed   :  { %v116_v19 = vadd.f32 %v109_v12, %v102_v15  ;;  %v88_v20 = vpop.f32.mrb[3].mxu0 }
  0xee   :  { %v117_v21 = vadd.f32 %v113_v14, %v103_v17 }
  0xef   :  { %vm118_vm1 = vcmp.ge.f32.partialorder %v116_v19, 0.0  ;;  %v120_v22 = vmul.f32 0.2, %v116_v19 }
  0xf0   :  { %vm119_vm2 = vcmp.ge.f32.partialorder %v117_v21, 0.0  ;;  %v121_v23 = vmul.f32 0.2, %v117_v21 }
  0xf1   :  { %v122_v24 = vsel %vm118_vm1, %v116_v19, %v120_v22 }
  0xf2   :  { %v123_v25 = vsel %vm119_vm2, %v117_v21, %v121_v23 }
  0xf3   :  { %v146_v26 = vpack.c.bf16 %v123_v25, %v122_v24 }
  0xf5   :  { %147 = vst.sshfl [vmem:[%s236_s4] sm:$0x33 pattern:$0x76325410] %v146_v26 }
  0xf6   :  { %142 = vsyncpa [#allocation3], 1 }

// kernel: tile.68
= control target key start
LH: loop header
LB: loop body
LE: loop exit
PB: predicated region body
PF: predicated region fallthrough
CT: control target
= control target key end

     0   :  { %s22_s0 = inlined_call_operand.vmem [shape: f32[16], index: 0, kind: input, shape index: {}]   ;;  %s23_s1 = inlined_call_operand.vmem [shape: f32[4,16], index: 1, kind: output, shape index: {}]  }
   0x1   :  { %v4_v0 = vld [vmem:[%s22_s0] ss:$0 sm:$0xff] }
   0x2   :  { %5 = vst [vmem:[%s23_s1] sm:$0xf] %v4_v0 }

// kernel: generator_forward.12
= control target key start
LH: loop header
LB: loop body
LE: loop exit
PB: predicated region body
PF: predicated region fallthrough
CT: control target
= control target key end

     0   :  { %9 = vsyncpa [#allocation3], 0  ;;  %s223_s15 = smov [#allocation2]   ;;  %s277_s0 = inlined_call_operand.vmem [shape: bf16[16,64], index: 0, kind: input, shape index: {}]   ;;  %s278_s1 = inlined_call_operand.hbm [shape: bf16[64,128], index: 1, kind: input, shape index: {}]   ;;  %s279_s2 = inlined_call_operand.vmem [shape: f32[1,128], index: 2, kind: input, shape index: {}]   ;;  %s280_s3 = inlined_call_operand.vmem [shape: f32[1,128], index: 3, kind: input, shape index: {}]   ;;  %s281_s4 = inlined_call_operand.vmem [shape: bf16[16,128], index: 4, kind: output, shape index: {}]  }
   0x1   :  { %s17_s16 = sshll.u32 %s223_s15, 4  ;;  %s199_s19 = scalar_lea.hbm %s278_s1, 512  ;;  %s18_s16 = int_to_ptr.vmem [resolvable:$true] %s17_s16 }
   0x2   :  { %p200_p0 = scmp.ne.s32.totalorder %s278_s1, %s199_s19  ;;  %p203_p1 = scmp.lt.u32.totalorder %s199_s19, %s278_s1 }
   0x4   :  { %p205_p2 = pnand %p203_p1, %p200_p0 }
   0x6   :  { %208 = shalt.err (!%p205_p2)
}
   0x7   :  { %s209_s24 = scalar_lea.vmem %s18_s16, 512  ;;  %p214_p4 = scmp.lt.s32.totalorder %s18_s16, %s18_s16 }
   0x8   :  { %p210_p3 = scmp.ne.s32.totalorder %s18_s16, %s209_s24  ;;  %p215_p5 = scmp.lt.s32.totalorder %s209_s24, %s209_s24 }
   0xa   :  { %p216_p6 = por %p215_p5, %p214_p4 }
   0xc   :  { %p217_p7 = pnand %p216_p6, %p210_p3 }
   0xe   :  { %220 = shalt.err (!%p217_p7)
}
   0xf   :  { %s224_s25 = smov 64   ;;  %s225_s26 = smov 4  }
  0x10   :  { %23 = dma.hbm_to_vmem [thread:$0]  %s278_s1, 512, %s18_s16, [#allocation3], %s224_s25, %s224_s25, %s225_s26  }
  0x11   :  { %221 = dma.done.wait [#allocation3], 512  }
  0x12   :  { %222 = vsyncadd [#allocation3], 4294966784  ;;  %v226_v0 = vmov 0.0   ;;  %vm227_vm0 = vmmov 0   ;;  %v194_v1 = vld [vmem:[#allocation2] sm:$0xff]   ;;  %v195_v2 = vld [vmem:[#allocation2 + $0x8] sm:$0xff]  }
  0x13   :  { %177 = vmatprep.subr.bf16.mxu0 %v226_v0  ;;  %185 = vmatprep.mubr.msk.bf16.mxu0 %vm227_vm0, %v226_v0  ;;  %v196_v3 = vld [vmem:[#allocation2 + $0x10] sm:$0xff]   ;;  %v197_v4 = vld [vmem:[#allocation2 + $0x18] sm:$0xff]   ;;  %v198_v5 = vld [vmem:[%s277_s0] sm:$0xff]   ;;  %vm71_vm1 = vcmask 523264  }
  0x14   :  { %178 = vmatpush3.bf16.msra.mxu0 %v194_v1  ;;  %v161_v6 = vld [vmem:[%s279_s2] ss:$0 sm:$0xff] }
  0x15   :  { %179 = vmatprep.subr.bf16.mxu0 %v226_v0  ;;  %v162_v8 = vld [vmem:[%s280_s3] ss:$0 sm:$0xff] }
  0x18   :  { %180 = vmatpush3.bf16.msra.mxu0 %v195_v2 }
  0x19   :  { %181 = vmatprep.subr.bf16.mxu0 %v226_v0 }
  0x1c   :  { %182 = vmatpush3.bf16.msra.mxu0 %v196_v3 }
  0x1d   :  { %183 = vmatprep.subr.bf16.mxu0 %v226_v0 }
  0x20   :  { %184 = vmatpush3.bf16.msra.mxu0 %v197_v4 }
  0x23   :  { %186 = vmatmul.mubr.msk.bf16.vlgmr.msra.gmra.mrb[0].mxu0 %vm71_vm1, %v198_v5 }
  0xf6   :  { %v109_v7 = vpop.f32.mrb[0].mxu0 }
  0xf7   :  { %v123_v9 = vmul.f32 %v161_v6, %v109_v7  ;;  %v187_v10 = vpop.f32.mrb[1].mxu0 }
  0xf8   :  { %v112_v11 = vpop.f32.mrb[2].mxu0 }
  0xf9   :  { %v132_v12 = vadd.f32 %v162_v8, %v123_v9  ;;  %v124_v13 = vmul.f32 %v161_v6, %v112_v11  ;;  %v188_v14 = vpop.f32.mrb[3].mxu0 }
  0xfb   :  { %v136_v15 = vmul.f32 0.2, %v132_v12  ;;  %v133_v16 = vadd.f32 %v162_v8, %v124_v13  ;;  %vm134_vm2 = vcmp.ge.f32.partialorder %v132_v12, 0.0 }
  0xfd   :  { %vm135_vm3 = vcmp.ge.f32.partialorder %v133_v16, 0.0  ;;  %v137_v17 = vmul.f32 0.2, %v133_v16  ;;  %v138_v18 = vsel %vm134_vm2, %v132_v12, %v136_v15 }
  0xff   :  { %v139_v19 = vsel %vm135_vm3, %v133_v16, %v137_v17 }
 0x100   :  { %v170_v20 = vpack.c.bf16 %v139_v19, %v138_v18 }
 0x102   :  { %171 = vst [vmem:[%s281_s4] sm:$0xff] %v170_v20  }
 0x103   :  { %154 = vsyncpa [#allocation3], 1 }

// kernel: tile.69
= control target key start
LH: loop header
LB: loop body
LE: loop exit
PB: predicated region body
PF: predicated region fallthrough
CT: control target
= control target key end

     0   :  { %vm7_vm0 = vcmask 130048   ;;  %s37_s8 = smov 16   ;;  %s38_s9 = smov 32   ;;  %vm13_vm1 = vcmask 523648   ;;  %vm19_vm2 = vcmask 392448   ;;  %vm25_vm3 = vcmask 261248   ;;  %s55_s0 = inlined_call_operand.vmem [shape: f32[4,16], index: 0, kind: input, shape index: {}]   ;;  %s56_s1 = inlined_call_operand.vmem [shape: f32[64], index: 1, kind: output, shape index: {}]  }
   0x1   :  { %v4_v0 = vld [vmem:[%s55_s0] sm:$0xf]  ;;  %s36_s0 = smov 48  }
   0x2   :  { %5 = vst [vmem:[#allocation1] sm:$0xf] %v4_v0 }
   0x9   :  { %v10_v1 = vld [vmem:[#allocation1 + $0x3] sm:$0x1]   ;;  %v22_v2 = vld [vmem:[#allocation1 + $0x1] sm:$0x1]   ;;  %v6_v3 = vld [vmem:[#allocation1] sm:$0x1]  }
   0xa   :  { %11 = vrot.lane.b32.xlu0 %v10_v1, %s36_s0  ;;  %23 = vrot.lane.b32.xlu1 %v22_v2, %s37_s8  ;;  %v16_v4 = vld [vmem:[#allocation1 + $0x2] sm:$0x1]   ;;  %8 = vst.msk [vmem:[#allocation0] sm:$0x1] %vm7_vm0, %v6_v3  }
   0xe   :  { %17 = vrot.lane.b32.xlu0 %v16_v4, %s38_s9 }
  0x7c   :  { %v12_v5 = vpop.permute.xlu0 %11   ;;  %v24_v6 = vpop.permute.xlu1 %23  }
  0x7d   :  { %14 = vst.msk [vmem:[#allocation0] sm:$0x1] %vm13_vm1, %v12_v5  }
  0x80   :  { %v18_v7 = vpop.permute.xlu0 %17  }
  0x81   :  { %20 = vst.msk [vmem:[#allocation0] sm:$0x1] %vm19_vm2, %v18_v7  }
  0x82   :  { %26 = vst.msk [vmem:[#allocation0] sm:$0x1] %vm25_vm3, %v24_v6  }
  0x89   :  { %v30_v8 = vld [vmem:[#allocation0] sm:$0x1] }
  0x8a   :  { %32 = vst [vmem:[%s56_s1] sm:$0x1] %v30_v8 }

// kernel: tile.78
= control target key start
LH: loop header
LB: loop body
LE: loop exit
PB: predicated region body
PF: predicated region fallthrough
CT: control target
= control target key end

     0   :  { %s22_s0 = inlined_call_operand.vmem [shape: f32[8], index: 0, kind: input, shape index: {}]   ;;  %s23_s1 = inlined_call_operand.vmem [shape: f32[4,8], index: 1, kind: output, shape index: {}]  }
   0x1   :  { %v4_v0 = vld [vmem:[%s22_s0] ss:$0 sm:$0xff] }
   0x2   :  { %5 = vst [vmem:[%s23_s1] sm:$0xf] %v4_v0 }

// kernel: tile.79
= control target key start
LH: loop header
LB: loop body
LE: loop exit
PB: predicated region body
PF: predicated region fallthrough
CT: control target
= control target key end

     0   :  { %vm7_vm0 = vcmask 64512   ;;  %s37_s8 = smov 8   ;;  %s38_s9 = smov 16   ;;  %vm13_vm1 = vcmask 261312   ;;  %vm19_vm2 = vcmask 195712   ;;  %vm25_vm3 = vcmask 130112   ;;  %s55_s0 = inlined_call_operand.vmem [shape: f32[4,8], index: 0, kind: input, shape index: {}]   ;;  %s56_s1 = inlined_call_operand.vmem [shape: f32[32], index: 1, kind: output, shape index: {}]  }
   0x1   :  { %v4_v0 = vld [vmem:[%s55_s0] sm:$0xf]  ;;  %s36_s0 = smov 24  }
   0x2   :  { %5 = vst [vmem:[#allocation1] sm:$0xf] %v4_v0 }
   0x9   :  { %v10_v1 = vld [vmem:[#allocation1 + $0x3] sm:$0x1]   ;;  %v22_v2 = vld [vmem:[#allocation1 + $0x1] sm:$0x1]   ;;  %v6_v3 = vld [vmem:[#allocation1] sm:$0x1]  }
   0xa   :  { %11 = vrot.lane.b32.xlu0 %v10_v1, %s36_s0  ;;  %23 = vrot.lane.b32.xlu1 %v22_v2, %s37_s8  ;;  %v16_v4 = vld [vmem:[#allocation1 + $0x2] sm:$0x1]   ;;  %8 = vst.msk [vmem:[#allocation0] sm:$0x1] %vm7_vm0, %v6_v3  }
   0xe   :  { %17 = vrot.lane.b32.xlu0 %v16_v4, %s38_s9 }
  0x7c   :  { %v12_v5 = vpop.permute.xlu0 %11   ;;  %v24_v6 = vpop.permute.xlu1 %23  }
  0x7d   :  { %14 = vst.msk [vmem:[#allocation0] sm:$0x1] %vm13_vm1, %v12_v5  }
  0x80   :  { %v18_v7 = vpop.permute.xlu0 %17  }
  0x81   :  { %20 = vst.msk [vmem:[#allocation0] sm:$0x1] %vm19_vm2, %v18_v7  }
  0x82   :  { %26 = vst.msk [vmem:[#allocation0] sm:$0x1] %vm25_vm3, %v24_v6  }
  0x89   :  { %v30_v8 = vld [vmem:[#allocation0] sm:$0x1] }
  0x8a   :  { %32 = vst [vmem:[%s56_s1] sm:$0x1] %v30_v8 }

// kernel: generator_forward.13
= control target key start
LH: loop header
LB: loop body
LE: loop exit
PB: predicated region body
PF: predicated region fallthrough
CT: control target
= control target key end

     0   :  { %7 = vsyncpa [#allocation3], 0  ;;  %s266_s9 = smov [#allocation2]   ;;  %s315_s0 = inlined_call_operand.vmem [shape: bf16[64,32], index: 0, kind: input, shape index: {}]   ;;  %s316_s1 = inlined_call_operand.hbm [shape: bf16[32,128], index: 1, kind: input, shape index: {}]   ;;  %s317_s2 = inlined_call_operand.vmem [shape: f32[2,128], index: 2, kind: output, shape index: {}]  }
   0x1   :  { %s15_s10 = sshll.u32 %s266_s9, 4  ;;  %s242_s13 = scalar_lea.hbm %s316_s1, 256  ;;  %s16_s10 = int_to_ptr.vmem [resolvable:$true] %s15_s10 }
   0x2   :  { %p243_p0 = scmp.ne.s32.totalorder %s316_s1, %s242_s13  ;;  %p246_p1 = scmp.lt.u32.totalorder %s242_s13, %s316_s1 }
   0x4   :  { %p248_p2 = pnand %p246_p1, %p243_p0 }
   0x6   :  { %251 = shalt.err (!%p248_p2)
}
   0x7   :  { %s252_s18 = scalar_lea.vmem %s16_s10, 256  ;;  %p257_p4 = scmp.lt.s32.totalorder %s16_s10, %s16_s10 }
   0x8   :  { %p253_p3 = scmp.ne.s32.totalorder %s16_s10, %s252_s18  ;;  %p258_p5 = scmp.lt.s32.totalorder %s252_s18, %s252_s18 }
   0xa   :  { %p259_p6 = por %p258_p5, %p257_p4 }
   0xc   :  { %p260_p7 = pnand %p259_p6, %p253_p3 }
   0xe   :  { %263 = shalt.err (!%p260_p7)
}
   0xf   :  { %s267_s19 = smov 64   ;;  %s268_s20 = smov 4  }
  0x10   :  { %21 = dma.hbm_to_vmem [thread:$0]  %s316_s1, 256, %s16_s10, [#allocation3], %s267_s19, %s267_s19, %s268_s20  }
  0x11   :  { %264 = dma.done.wait [#allocation3], 256  }
  0x12   :  { %265 = vsyncadd [#allocation3], 4294967040  ;;  %v236_v0 = vld [vmem:[#allocation2] sm:$0xff]   ;;  %v237_v1 = vld [vmem:[#allocation2 + $0x8] sm:$0xff]   ;;  %vm70_vm0 = vcmask 261120   ;;  %vm182_vm1 = vcmask 1040384  }
  0x13   :  { %217 = vmatprep.subr.bf16.mxu0 %v236_v0  ;;  %229 = vmatprep.subr.bf16.mxu1 %v236_v0  ;;  %v238_v2 = vld [vmem:[%s315_s0] sm:$0xff]   ;;  %v240_v3 = vld [vmem:[%s315_s0 + $0x10] sm:$0xff]   ;;  %v239_v4 = vld [vmem:[%s315_s0 + $0x8] sm:$0xff]  }
  0x14   :  { %218 = vmatpush3.bf16.msra.mxu0 %v236_v0  ;;  %231 = vmatpush3.bf16.msra.mxu1 %v236_v0  ;;  %v241_v5 = vld [vmem:[%s315_s0 + $0x18] sm:$0xff]  }
  0x15   :  { %219 = vmatprep.subr.bf16.mxu0 %v237_v1  ;;  %221 = vmatprep.mubr.msk.bf16.mxu0 %vm70_vm0, %v238_v2 }
  0x16   :  { %230 = vmatprep.subr.bf16.mxu1 %v237_v1  ;;  %225 = vmatprep.mubr.msk.bf16.mxu1 %vm70_vm0, %v240_v3 }
  0x18   :  { %220 = vmatpush3.bf16.msra.mxu0 %v237_v1  ;;  %232 = vmatpush3.bf16.msra.mxu1 %v237_v1 }
  0x1b   :  { %222 = vmatmul.mubr.msk.bf16.vlgmr.msra.gmra.mrb[0].mxu0 %vm70_vm0, %v239_v4  ;;  %226 = vmatmul.mubr.msk.bf16.vlgmr.msra.gmra.mrb[0].mxu1 %vm70_vm0, %v241_v5 }
  0xee   :  { %v223_v6 = vpop.f32.mrb[0].mxu0  ;;  %v227_v7 = vpop.f32.mrb[0].mxu1 }
  0xef   :  { %v117_v8 = vpop.f32.mrb[1].mxu0  ;;  %v133_v9 = vpop.f32.mrb[1].mxu1  ;;  %v163_v17 = vmul.f32 %v223_v6, %v223_v6  ;;  %v167_v29 = vmul.f32 %v227_v7, %v227_v7 }
  0xf0   :  { %v224_v10 = vpop.f32.mrb[2].mxu0  ;;  %v228_v11 = vpop.f32.mrb[2].mxu1  ;;  %v161_v14 = vmul.f32 %v117_v8, %v117_v8  ;;  %v165_v23 = vmul.f32 %v133_v9, %v133_v9 }
  0xf1   :  { %v120_v12 = vpop.f32.mrb[3].mxu0  ;;  %v136_v13 = vpop.f32.mrb[3].mxu1  ;;  %v164_v20 = vmul.f32 %v224_v10, %v224_v10  ;;  %v168_v32 = vmul.f32 %v228_v11, %v228_v11 }
  0xf2   :  { %v148_v15 = vadd.f32 %v120_v12, %v117_v8  ;;  %v162_v16 = vmul.f32 %v120_v12, %v120_v12  ;;  %v166_v28 = vmul.f32 %v136_v13, %v136_v13 }
  0xf4   :  { %v149_v18 = vadd.f32 %v223_v6, %v148_v15  ;;  %v169_v19 = vadd.f32 %v162_v16, %v161_v14 }
  0xf6   :  { %v170_v21 = vadd.f32 %v169_v19, %v163_v17  ;;  %v150_v22 = vadd.f32 %v224_v10, %v149_v18 }
  0xf8   :  { %v151_v24 = vadd.f32 %v150_v22, %v133_v9  ;;  %v171_v25 = vadd.f32 %v170_v21, %v164_v20 }
  0xfa   :  { %v172_v26 = vadd.f32 %v171_v25, %v165_v23  ;;  %v152_v27 = vadd.f32 %v151_v24, %v136_v13 }
  0xfc   :  { %v153_v30 = vadd.f32 %v227_v7, %v152_v27  ;;  %v173_v31 = vadd.f32 %v172_v26, %v166_v28 }
  0xfe   :  { %v154_v33 = vadd.f32 %v228_v11, %v153_v30  ;;  %v174_v34 = vadd.f32 %v173_v31, %v167_v29 }
 0x100   :  { %v155_v35 = vrot.slane %v154_v33, 4  ;;  %v175_v36 = vadd.f32 %v174_v34, %v168_v32 }
 0x102   :  { %v156_v37 = vadd.f32 %v155_v35, %v154_v33  ;;  %v176_v38 = vrot.slane %v175_v36, 4 }
 0x104   :  { %v157_v39 = vrot.slane %v156_v37, 2  ;;  %v177_v40 = vadd.f32 %v176_v38, %v175_v36 }
 0x106   :  { %v158_v41 = vadd.f32 %v157_v39, %v156_v37  ;;  %v178_v42 = vrot.slane %v177_v40, 2 }
 0x108   :  { %v159_v43 = vrot.slane %v158_v41, 1  ;;  %v179_v44 = vadd.f32 %v178_v42, %v177_v40 }
 0x10a   :  { %v180_v45 = vrot.slane %v179_v44, 1  ;;  %v160_v46 = vadd.f32 %v159_v43, %v158_v41 }
 0x10c   :  { %v181_v47 = vadd.f32 %v180_v45, %v179_v44 }
 0x10e   :  { %v183_v48 = vsel %vm182_vm1, %v160_v46, %v181_v47 }
 0x10f   :  { %188 = vst [vmem:[%s317_s2] sm:$0x3] %v183_v48 }
 0x110   :  { %200 = vsyncpa [#allocation3], 1 }

// kernel: generator_forward.14
= control target key start
LH: loop header
LB: loop body
LE: loop exit
PB: predicated region body
PF: predicated region fallthrough
CT: control target
= control target key end

     0   :  { %9 = vsyncpa [#allocation3], 0  ;;  %s359_s15 = smov [#allocation2]   ;;  %s431_s0 = inlined_call_operand.vmem [shape: bf16[64,32], index: 0, kind: input, shape index: {}]   ;;  %s432_s1 = inlined_call_operand.hbm [shape: bf16[32,128], index: 1, kind: input, shape index: {}]   ;;  %s433_s2 = inlined_call_operand.vmem [shape: f32[1,128], index: 2, kind: input, shape index: {}]   ;;  %s434_s3 = inlined_call_operand.vmem [shape: f32[1,128], index: 3, kind: input, shape index: {}]   ;;  %s435_s4 = inlined_call_operand.vmem [shape: bf16[64,128], index: 4, kind: output, shape index: {}]  }
   0x1   :  { %s17_s16 = sshll.u32 %s359_s15, 4  ;;  %s335_s19 = scalar_lea.hbm %s432_s1, 256  ;;  %s18_s16 = int_to_ptr.vmem [resolvable:$true] %s17_s16 }
   0x2   :  { %p336_p0 = scmp.ne.s32.totalorder %s432_s1, %s335_s19  ;;  %p339_p1 = scmp.lt.u32.totalorder %s335_s19, %s432_s1 }
   0x4   :  { %p341_p2 = pnand %p339_p1, %p336_p0 }
   0x6   :  { %344 = shalt.err (!%p341_p2)
}
   0x7   :  { %s345_s24 = scalar_lea.vmem %s18_s16, 256  ;;  %p350_p4 = scmp.lt.s32.totalorder %s18_s16, %s18_s16 }
   0x8   :  { %p346_p3 = scmp.ne.s32.totalorder %s18_s16, %s345_s24  ;;  %p351_p5 = scmp.lt.s32.totalorder %s345_s24, %s345_s24 }
   0xa   :  { %p352_p6 = por %p351_p5, %p350_p4 }
   0xc   :  { %p353_p7 = pnand %p352_p6, %p346_p3 }
   0xe   :  { %356 = shalt.err (!%p353_p7)
}
   0xf   :  { %s360_s25 = smov 64   ;;  %s361_s26 = smov 4  }
  0x10   :  { %23 = dma.hbm_to_vmem [thread:$0]  %s432_s1, 256, %s18_s16, [#allocation3], %s360_s25, %s360_s25, %s361_s26  }
  0x11   :  { %357 = dma.done.wait [#allocation3], 256  }
  0x12   :  { %358 = vsyncadd [#allocation3], 4294967040  ;;  %v329_v0 = vld [vmem:[#allocation2] sm:$0xff]   ;;  %v330_v1 = vld [vmem:[#allocation2 + $0x8] sm:$0xff]   ;;  %vm76_vm0 = vcmask 261120  }
  0x13   :  { %310 = vmatprep.subr.bf16.mxu0 %v329_v0  ;;  %322 = vmatprep.subr.bf16.mxu1 %v329_v0  ;;  %v331_v2 = vld [vmem:[%s431_s0] sm:$0xff]   ;;  %v332_v3 = vld [vmem:[%s431_s0 + $0x10] sm:$0xff]   ;;  %v333_v4 = vld [vmem:[%s431_s0 + $0x8] sm:$0xff]  }
  0x14   :  { %311 = vmatpush3.bf16.msra.mxu0 %v329_v0  ;;  %324 = vmatpush3.bf16.msra.mxu1 %v329_v0  ;;  %v334_v5 = vld [vmem:[%s431_s0 + $0x18] sm:$0xff]   ;;  %v263_v6 = vld [vmem:[%s433_s2] ss:$0 sm:$0xff] }
  0x15   :  { %312 = vmatprep.subr.bf16.mxu0 %v330_v1  ;;  %323 = vmatprep.subr.bf16.mxu1 %v330_v1  ;;  %v264_v8 = vld [vmem:[%s434_s3] ss:$0 sm:$0xff] }
  0x16   :  { %314 = vmatprep.mubr.msk.bf16.mxu0 %vm76_vm0, %v331_v2  ;;  %318 = vmatprep.mubr.msk.bf16.mxu1 %vm76_vm0, %v332_v3 }
  0x18   :  { %313 = vmatpush3.bf16.msra.mxu0 %v330_v1  ;;  %325 = vmatpush3.bf16.msra.mxu1 %v330_v1 }
  0x1b   :  { %315 = vmatmul.mubr.msk.bf16.vlgmr.msra.gmra.mrb[0].mxu0 %vm76_vm0, %v333_v4  ;;  %319 = vmatmul.mubr.msk.bf16.vlgmr.msra.gmra.mrb[0].mxu1 %vm76_vm0, %v334_v5 }
  0xee   :  { %v316_v7 = vpop.f32.mrb[0].mxu0  ;;  %v320_v9 = vpop.f32.mrb[0].mxu1 }
  0xef   :  { %v163_v10 = vmul.f32 %v316_v7, %v263_v6  ;;  %v167_v11 = vmul.f32 %v320_v9, %v263_v6  ;;  %v123_v12 = vpop.f32.mrb[1].mxu0  ;;  %v139_v13 = vpop.f32.mrb[1].mxu1 }
  0xf0   :  { %v161_v14 = vmul.f32 %v263_v6, %v123_v12  ;;  %v165_v15 = vmul.f32 %v263_v6, %v139_v13  ;;  %v317_v16 = vpop.f32.mrb[2].mxu0  ;;  %v321_v17 = vpop.f32.mrb[2].mxu1 }
  0xf1   :  { %v178_v18 = vadd.f32 %v264_v8, %v163_v10  ;;  %v182_v19 = vadd.f32 %v264_v8, %v167_v11  ;;  %v164_v20 = vmul.f32 %v317_v16, %v263_v6  ;;  %v168_v21 = vmul.f32 %v321_v17, %v263_v6  ;;  %v126_v22 = vpop.f32.mrb[3].mxu0  ;;  %v142_v23 = vpop.f32.mrb[3].mxu1 }
  0xf2   :  { %v176_v24 = vadd.f32 %v264_v8, %v161_v14  ;;  %v180_v25 = vadd.f32 %v264_v8, %v165_v15  ;;  %v162_v26 = vmul.f32 %v263_v6, %v126_v22  ;;  %v166_v27 = vmul.f32 %v263_v6, %v142_v23 }
  0xf3   :  { %vm186_vm1 = vcmp.ge.f32.partialorder %v178_v18, 0.0  ;;  %v194_v28 = vmul.f32 0.2, %v178_v18  ;;  %vm190_vm2 = vcmp.ge.f32.partialorder %v182_v19, 0.0  ;;  %v198_v29 = vmul.f32 0.2, %v182_v19 }
  0xf4   :  { %vm184_vm3 = vcmp.ge.f32.partialorder %v176_v24, 0.0  ;;  %v192_v30 = vmul.f32 0.2, %v176_v24  ;;  %vm188_vm4 = vcmp.ge.f32.partialorder %v180_v25, 0.0  ;;  %v196_v31 = vmul.f32 0.2, %v180_v25 }
  0xf5   :  { %v179_v32 = vadd.f32 %v264_v8, %v164_v20  ;;  %v183_v33 = vadd.f32 %v264_v8, %v168_v21  ;;  %v202_v34 = vsel %vm186_vm1, %v178_v18, %v194_v28  ;;  %v206_v35 = vsel %vm190_vm2, %v182_v19, %v198_v29 }
  0xf6   :  { %v177_v36 = vadd.f32 %v264_v8, %v162_v26  ;;  %v181_v37 = vadd.f32 %v264_v8, %v166_v27  ;;  %v200_v42 = vsel %vm184_vm3, %v176_v24, %v192_v30  ;;  %v204_v43 = vsel %vm188_vm4, %v180_v25, %v196_v31 }
  0xf7   :  { %vm187_vm5 = vcmp.ge.f32.partialorder %v179_v32, 0.0  ;;  %v195_v38 = vmul.f32 0.2, %v179_v32  ;;  %vm191_vm6 = vcmp.ge.f32.partialorder %v183_v33, 0.0  ;;  %v199_v39 = vmul.f32 0.2, %v183_v33 }
  0xf8   :  { %vm185_vm7 = vcmp.ge.f32.partialorder %v177_v36, 0.0  ;;  %v193_v40 = vmul.f32 0.2, %v177_v36  ;;  %vm189_vm8 = vcmp.ge.f32.partialorder %v181_v37, 0.0  ;;  %v197_v41 = vmul.f32 0.2, %v181_v37 }
  0xf9   :  { %v203_v44 = vsel %vm187_vm5, %v179_v32, %v195_v38  ;;  %v207_v45 = vsel %vm191_vm6, %v183_v33, %v199_v39 }
  0xfa   :  { %v289_v46 = vpack.c.bf16 %v203_v44, %v202_v34  ;;  %v299_v47 = vpack.c.bf16 %v207_v45, %v206_v35  ;;  %v201_v48 = vsel %vm185_vm7, %v177_v36, %v193_v40  ;;  %v205_v49 = vsel %vm189_vm8, %v181_v37, %v197_v41 }
  0xfb   :  { %v284_v50 = vpack.c.bf16 %v201_v48, %v200_v42  ;;  %v294_v51 = vpack.c.bf16 %v205_v49, %v204_v43 }
  0xfc   :  { %301 = vst [vmem:[%s435_s4 + $0x8] sm:$0xff] %v289_v46   ;;  %303 = vst [vmem:[%s435_s4 + $0x18] sm:$0xff] %v299_v47  }
  0xfd   :  { %285 = vst [vmem:[%s435_s4] sm:$0xff] %v284_v50   ;;  %302 = vst [vmem:[%s435_s4 + $0x10] sm:$0xff] %v294_v51  }
  0xfe   :  { %252 = vsyncpa [#allocation3], 1 }

// kernel: generator_forward.15
= control target key start
LH: loop header
LB: loop body
LE: loop exit
PB: predicated region body
PF: predicated region fallthrough
CT: control target
= control target key end

     0   :  { %7 = vsyncpa [#allocation3], 0  ;;  %s689_s9 = smov 0   ;;  %s691_s10 = smov 0   ;;  %s780_s0 = inlined_call_operand.vmem [shape: bf16[256,16], index: 0, kind: input, shape index: {}]   ;;  %s781_s1 = inlined_call_operand.hbm [shape: bf16[16,128], index: 1, kind: input, shape index: {}]   ;;  %s782_s2 = inlined_call_operand.vmem [shape: f32[2,128], index: 2, kind: output, shape index: {}]  }
   0x1   :  { %s693_s11 = smov 0  }
   0x2 LB: > { %s510_s12 = sadd.s32 4294967295, %s669_s11   ;;  %s22_s13 = sadd.s32 1, %s665_s10  ;;  %s669_s11 = sphi %s693_s11, %s13_s11   ;;  %s665_s10 = sphi %s691_s10, %s792_s10   ;;  %s661_s9 = sphi %s689_s9, %s791_s9  }
   0x3   : > { %p23_p0 = scmp.ge.s32.totalorder %s22_s13, 2  ;;  %p511_p1 = scmp.ge.s32.totalorder %s669_s11, 1 }
   0x4   : > { %p108_p2 = scmp.lt.s32.totalorder %s669_s11, 3  ;;  %p714_p4 = scmp.eq.s32.totalorder %s510_s12, 0 }
   0x5   : > { %s794_s13 = smov (%p23_p0, %s22_s13), 0  ;;  %s671_s16 = smov [#allocation2]  }
   0x6   : > { %p710_p3 = pnand %p511_p1, %p108_p2  ;;  %s122_s17 = sshll.u32 %s671_s16, 4  ;;  %s123_s17 = int_to_ptr.vmem [resolvable:$true] %s122_s17 }
   0x7   : > { %s787_s15 = scalar_select %p714_p4, 1, 0 }
   0x8   : > { %s786_s14 = scalar_select %p710_p3, 1, 0 }
   0x9   : > { %p573_p5 = pneg %p710_p3  ;;  %s615_s21 = scalar_lea.hbm %s781_s1, 128 }
   0xa   : > { %p616_p7 = scmp.ne.s32.totalorder %s781_s1, %s615_s21  ;;  %p622_p11 = scmp.lt.u32.totalorder %s615_s21, %s781_s1 }
   0xb   : > { %p722_p6 = pnand %p714_p4, %p573_p5 }
   0xd   : > { %p617_p8 = pneg %p722_p6 }
   0xf   : > { %p618_p9 = pnand %p617_p8, %p616_p7 }
  0x11   : > { %p619_p10 = pneg %p618_p9 }
  0x13   : > { %p624_p12 = pnand %p622_p11, %p619_p10 }
  0x15   : > { %627 = shalt.err (!%p624_p12)
}
  0x16   : > { %s628_s26 = scalar_lea.vmem %s123_s17, 128  ;;  %p636_p2 = scmp.lt.s32.totalorder %s123_s17, %s123_s17 }
  0x17   : > { %p629_p13 = scmp.ne.s32.totalorder %s123_s17, %s628_s26  ;;  %p637_p5 = scmp.lt.s32.totalorder %s628_s26, %s628_s26 }
  0x19   : > { %p631_p0 = pnand %p629_p13, %p617_p8  ;;  %p638_p4 = por %p637_p5, %p636_p2 }
  0x1b   : > { %p632_p1 = pneg %p631_p0 }
  0x1d   : > { %p639_p3 = pnand %p638_p4, %p632_p1 }
  0x1f   : > { %642 = shalt.err (!%p639_p3)
}
  0x20   : > { %s672_s27 = smov 64   ;;  %s673_s28 = smov 4  }
  0x21   : > { %576 = dma.hbm_to_vmem [thread:$0]  (!%p722_p6), %s781_s1, 128, %s123_s17, [#allocation3], %s672_s27, %s672_s27, %s673_s28  }
  0x22   : > { %p789_p7 = scmp.ne.s32.totalorder %s786_s14, 0 }
  0x23   : > { %p790_p9 = scmp.ne.s32.totalorder (!%p789_p7), %s787_s15, 0 }
  0x24   : > { %147 = sbr.rel (%p789_p7) target bundleno = 323 (0x143), region = 28 }
  0x2b   : > { %656 = dma.done.wait (%p790_p9), [#allocation3], 128  }
  0x2c   : > { %658 = vsyncadd (%p790_p9), [#allocation3], 4294967168  ;;  %s516_s3 = sshll.u32 %s661_s9, 4  ;;  %v606_v0 = vld [vmem:[#allocation2] sm:$0xff]   ;;  %vm243_vm0 = vcmask 130048   ;;  %vm423_vm1 = vcmask 1040384  }
  0x2d   : > { %p169_p3 = scmp.lt.s32.totalorder %s516_s3, 31  ;;  %549 = vmatprep.subr.bf16.mxu0 %v606_v0  ;;  %567 = vmatprep.subr.bf16.mxu1 %v606_v0  ;;  %p535_p4 = scmp.ne.s32.totalorder %s661_s9, 0 }
  0x2e   : > { %550 = vmatpush3.bf16.msra.mxu0 %v606_v0  ;;  %568 = vmatpush3.bf16.msra.mxu1 %v606_v0 }
  0x2f   : > { %s796_s3 = smov (!%p169_p3, %s516_s3), 31 }
  0x30   : > { %s517_s4 = sshll.u32 %s796_s3, 2 }
  0x31   : > { %s172_s7 = scalar_lea.vmem %s780_s0, %s517_s4 }
  0x32   : > { %v607_v1 = vld [vmem:[%s172_s7] sm:$0xff]   ;;  %v608_v2 = vld [vmem:[%s172_s7 + $0x8] sm:$0xff]   ;;  %v609_v3 = vld [vmem:[%s172_s7 + $0x10] sm:$0xff]  }
  0x33   : > { %551 = vmatprep.mubr.msk.bf16.mxu0 %vm243_vm0, %v607_v1  ;;  %v611_v4 = vld [vmem:[%s172_s7 + $0x20] sm:$0xff]   ;;  %v612_v5 = vld [vmem:[%s172_s7 + $0x28] sm:$0xff]   ;;  %v613_v6 = vld [vmem:[%s172_s7 + $0x30] sm:$0xff]  }
  0x34   : > { %552 = vmatmul.mubr.msk.bf16.vlgmr.msra.gmra.mrb[0].mxu0 %vm243_vm0, %v608_v2  ;;  %559 = vmatprep.mubr.msk.bf16.mxu1 %vm243_vm0, %v611_v4  ;;  %v610_v7 = vld [vmem:[%s172_s7 + $0x18] sm:$0xff]  }
  0x35   : > { %555 = vmatprep.mubr.msk.bf16.mxu0 %vm243_vm0, %v609_v3  ;;  %560 = vmatmul.mubr.msk.bf16.vlgmr.msra.gmra.mrb[0].mxu1 %vm243_vm0, %v612_v5  ;;  %v614_v8 = vld [vmem:[%s172_s7 + $0x38] sm:$0xff]  }
  0x36   : > { %563 = vmatprep.mubr.msk.bf16.mxu1 %vm243_vm0, %v613_v6 }
  0x3c   : > { %556 = vmatmul.mubr.msk.bf16.gmra.mrb[4].mxu0 %vm243_vm0, %v610_v7 }
  0x3d   : > { %564 = vmatmul.mubr.msk.bf16.gmra.mrb[4].mxu1 %vm243_vm0, %v614_v8 }
 0x107   : > { %v553_v9 = vpop.f32.mrb[0].mxu0 }
 0x108   : > { %v302_v10 = vpop.f32.mrb[1].mxu0  ;;  %v561_v12 = vpop.f32.mrb[0].mxu1  ;;  %v388_v20 = vmul.f32 %v553_v9, %v553_v9 }
 0x109   : > { %v554_v11 = vpop.f32.mrb[2].mxu0  ;;  %v334_v14 = vpop.f32.mrb[1].mxu1  ;;  %v386_v15 = vmul.f32 %v302_v10, %v302_v10  ;;  %v396_v52 = vmul.f32 %v561_v12, %v561_v12 }
 0x10a   : > { %v305_v13 = vpop.f32.mrb[3].mxu0  ;;  %v562_v18 = vpop.f32.mrb[2].mxu1  ;;  %v389_v23 = vmul.f32 %v554_v11, %v554_v11  ;;  %v394_v46 = vmul.f32 %v334_v14, %v334_v14 }
 0x10b   : > { %v365_v16 = vadd.f32 %v305_v13, %v302_v10  ;;  %v387_v17 = vmul.f32 %v305_v13, %v305_v13  ;;  %v337_v19 = vpop.f32.mrb[3].mxu1  ;;  %v397_v55 = vmul.f32 %v562_v18, %v562_v18 }
 0x10c   : > { %v395_v51 = vmul.f32 %v337_v19, %v337_v19 }
 0x10d   : > { %v366_v21 = vadd.f32 %v553_v9, %v365_v16  ;;  %v402_v22 = vadd.f32 %v387_v17, %v386_v15 }
 0x10f   : > { %v403_v24 = vadd.f32 %v402_v22, %v388_v20  ;;  %v557_v25 = vpop.f32.mrb[4].mxu0  ;;  %v367_v26 = vadd.f32 %v554_v11, %v366_v21 }
 0x110   : > { %v318_v27 = vpop.f32.mrb[5].mxu0  ;;  %v565_v32 = vpop.f32.mrb[4].mxu1  ;;  %v392_v40 = vmul.f32 %v557_v25, %v557_v25 }
 0x111   : > { %v368_v28 = vadd.f32 %v367_v26, %v318_v27  ;;  %v390_v29 = vmul.f32 %v318_v27, %v318_v27  ;;  %v404_v30 = vadd.f32 %v403_v24, %v389_v23  ;;  %v558_v31 = vpop.f32.mrb[6].mxu0  ;;  %v350_v34 = vpop.f32.mrb[5].mxu1  ;;  %v400_v0 = vmul.f32 %v565_v32, %v565_v32 }
 0x112   : > { %v321_v33 = vpop.f32.mrb[7].mxu0  ;;  %v566_v38 = vpop.f32.mrb[6].mxu1  ;;  %v393_v43 = vmul.f32 %v558_v31, %v558_v31  ;;  %v398_v58 = vmul.f32 %v350_v34, %v350_v34 }
 0x113   : > { %v405_v35 = vadd.f32 %v404_v30, %v390_v29  ;;  %v369_v36 = vadd.f32 %v368_v28, %v321_v33  ;;  %v391_v37 = vmul.f32 %v321_v33, %v321_v33  ;;  %v353_v39 = vpop.f32.mrb[7].mxu1  ;;  %v401_v3 = vmul.f32 %v566_v38, %v566_v38 }
 0x114   : > { %v399_v63 = vmul.f32 %v353_v39, %v353_v39 }
 0x115   : > { %v370_v41 = vadd.f32 %v557_v25, %v369_v36  ;;  %v406_v42 = vadd.f32 %v405_v35, %v391_v37 }
 0x117   : > { %v407_v44 = vadd.f32 %v406_v42, %v392_v40  ;;  %v371_v45 = vadd.f32 %v558_v31, %v370_v41 }
 0x119   : > { %v372_v47 = vadd.f32 %v371_v45, %v334_v14  ;;  %v408_v48 = vadd.f32 %v407_v44, %v393_v43 }
 0x11b   : > { %v409_v49 = vadd.f32 %v408_v48, %v394_v46  ;;  %v373_v50 = vadd.f32 %v372_v47, %v337_v19 }
 0x11d   : > { %v374_v53 = vadd.f32 %v561_v12, %v373_v50  ;;  %v410_v54 = vadd.f32 %v409_v49, %v395_v51 }
 0x11f   : > { %v411_v56 = vadd.f32 %v410_v54, %v396_v52  ;;  %v375_v57 = vadd.f32 %v562_v18, %v374_v53 }
 0x121   : > { %v376_v59 = vadd.f32 %v375_v57, %v350_v34  ;;  %v412_v60 = vadd.f32 %v411_v56, %v397_v55 }
 0x123   : > { %v413_v61 = vadd.f32 %v412_v60, %v398_v58  ;;  %v377_v62 = vadd.f32 %v376_v59, %v353_v39 }
 0x125   : > { %v378_v1 = vadd.f32 %v565_v32, %v377_v62  ;;  %v414_v2 = vadd.f32 %v413_v61, %v399_v63 }
 0x127   : > { %v379_v4 = vadd.f32 %v566_v38, %v378_v1  ;;  %v415_v5 = vadd.f32 %v414_v2, %v400_v0 }
 0x129   : > { %v380_v6 = vrot.slane %v379_v4, 4  ;;  %v416_v7 = vadd.f32 %v415_v5, %v401_v3 }
 0x12b   : > { %v381_v8 = vadd.f32 %v380_v6, %v379_v4  ;;  %v417_v9 = vrot.slane %v416_v7, 4 }
 0x12d   : > { %v382_v10 = vrot.slane %v381_v8, 2  ;;  %v418_v11 = vadd.f32 %v417_v9, %v416_v7 }
 0x12f   : > { %v383_v12 = vadd.f32 %v382_v10, %v381_v8  ;;  %v419_v13 = vrot.slane %v418_v11, 2 }
 0x131   : > { %v384_v14 = vrot.slane %v383_v12, 1  ;;  %v420_v15 = vadd.f32 %v419_v13, %v418_v11  ;;  %428 = sbr.rel (%p535_p4) target bundleno = 313 (0x139), region = 36 }
 0x133   : > { %v421_v16 = vrot.slane %v420_v15, 1  ;;  %v385_v17 = vadd.f32 %v384_v14, %v383_v12 }
 0x135   : > { %v422_v18 = vadd.f32 %v421_v16, %v420_v15 }
 0x137   : > { %v424_v19 = vsel %vm423_vm1, %v385_v17, %v422_v18 }
 0x138   : > { %429 = vst [vmem:[%s782_s2] sm:$0x3] %v424_v19 }
 0x139 PF: > { %p536_p6 = scmp.le.s32.totalorder %s661_s9, 0 }
 0x13b   : > { %433 = sbr.rel (%p536_p6) target bundleno = 323 (0x143), region = 40 }
 0x13f   : > { %v434_v20 = vld [vmem:[%s782_s2] sm:$0x3] (!%p536_p6) }
 0x140   : > { %v435_v21 = vadd.f32 (!%p536_p6), %v434_v20, %v424_v19 }
 0x142   : > { %436 = vst [vmem:[%s782_s2] sm:$0x3] %v435_v21 }
 0x143 PF: > { %s13_s11 = sadd.s32 1, %s669_s11   ;;  %s791_s9 = smov %s665_s10 }
 0x144   : > { %p10_p8 = scmp.ge.s32.totalorder %s13_s11, 4   ;;  %s792_s10 = smov %s794_s13 }
 0x146   :  { %12 = sbr.rel (!%p10_p8) target bundleno = 2 (0x2), region = 72 }
 0x14d   :  { %456 = vsyncpa [#allocation3], 1 }
 0x14e   :  { %458 = vsyncpa [#allocation3 + $0x1], 1 }

// kernel: generator_forward.16
= control target key start
LH: loop header
LB: loop body
LE: loop exit
PB: predicated region body
PF: predicated region fallthrough
CT: control target
= control target key end

     0   :  { %9 = vsyncpa [#allocation3], 0  ;;  %s1017_s15 = smov 0   ;;  %s1019_s16 = smov 0   ;;  %s1159_s0 = inlined_call_operand.vmem [shape: bf16[256,16], index: 0, kind: input, shape index: {}]   ;;  %s1160_s1 = inlined_call_operand.hbm [shape: bf16[16,128], index: 1, kind: input, shape index: {}]   ;;  %s1161_s2 = inlined_call_operand.vmem [shape: f32[1,128], index: 2, kind: input, shape index: {}]   ;;  %s1162_s3 = inlined_call_operand.vmem [shape: f32[1,128], index: 3, kind: input, shape index: {}]   ;;  %s1163_s4 = inlined_call_operand.vmem [shape: bf16[256,128], index: 4, kind: output, shape index: {}]  }
   0x1   :  { %s1021_s17 = smov 0  }
   0x2 LB: > { %s745_s18 = sadd.s32 4294967295, %s987_s17   ;;  %s27_s19 = sadd.s32 1, %s983_s16  ;;  %s987_s17 = sphi %s1021_s17, %s15_s17   ;;  %s983_s16 = sphi %s1019_s16, %s1173_s16   ;;  %s979_s15 = sphi %s1017_s15, %s1172_s15  }
   0x3   : > { %p29_p0 = scmp.ge.s32.totalorder %s27_s19, 2  ;;  %p747_p1 = scmp.ge.s32.totalorder %s987_s17, 1 }
   0x4   : > { %p164_p2 = scmp.lt.s32.totalorder %s987_s17, 3  ;;  %p1042_p4 = scmp.eq.s32.totalorder %s745_s18, 0 }
   0x5   : > { %s1175_s19 = smov (%p29_p0, %s27_s19), 0  ;;  %s989_s22 = smov [#allocation2]  }
   0x6   : > { %p1038_p3 = pnand %p747_p1, %p164_p2  ;;  %s178_s23 = sshll.u32 %s989_s22, 4  ;;  %s179_s23 = int_to_ptr.vmem [resolvable:$true] %s178_s23 }
   0x7   : > { %s1168_s21 = scalar_select %p1042_p4, 1, 0 }
   0x8   : > { %s1167_s20 = scalar_select %p1038_p3, 1, 0 }
   0x9   : > { %p891_p5 = pneg %p1038_p3  ;;  %s933_s27 = scalar_lea.hbm %s1160_s1, 128 }
   0xa   : > { %p934_p7 = scmp.ne.s32.totalorder %s1160_s1, %s933_s27  ;;  %p940_p11 = scmp.lt.u32.totalorder %s933_s27, %s1160_s1 }
   0xb   : > { %p1050_p6 = pnand %p1042_p4, %p891_p5 }
   0xd   : > { %p935_p8 = pneg %p1050_p6 }
   0xf   : > { %p936_p9 = pnand %p935_p8, %p934_p7 }
  0x11   : > { %p937_p10 = pneg %p936_p9 }
  0x13   : > { %p942_p12 = pnand %p940_p11, %p937_p10 }
  0x15   : > { %945 = shalt.err (!%p942_p12)
}
  0x16   : > { %s946_s6 = scalar_lea.vmem %s179_s23, 128  ;;  %p954_p2 = scmp.lt.s32.totalorder %s179_s23, %s179_s23 }
  0x17   : > { %p947_p13 = scmp.ne.s32.totalorder %s179_s23, %s946_s6  ;;  %p955_p5 = scmp.lt.s32.totalorder %s946_s6, %s946_s6 }
  0x19   : > { %p949_p0 = pnand %p947_p13, %p935_p8  ;;  %p956_p4 = por %p955_p5, %p954_p2 }
  0x1b   : > { %p950_p1 = pneg %p949_p0 }
  0x1d   : > { %p957_p3 = pnand %p956_p4, %p950_p1 }
  0x1f   : > { %960 = shalt.err (!%p957_p3)
}
  0x20   : > { %s990_s7 = smov 64   ;;  %s991_s8 = smov 4  }
  0x21   : > { %894 = dma.hbm_to_vmem [thread:$0]  (!%p1050_p6), %s1160_s1, 128, %s179_s23, [#allocation3], %s990_s7, %s990_s7, %s991_s8  }
  0x22   : > { %p1170_p7 = scmp.ne.s32.totalorder %s1167_s20, 0 }
  0x23   : > { %p1171_p9 = scmp.ne.s32.totalorder (!%p1170_p7), %s1168_s21, 0 }
  0x24   : > { %215 = sbr.rel (%p1170_p7) target bundleno = 292 (0x124), region = 36 }
  0x2b   : > { %974 = dma.done.wait (%p1171_p9), [#allocation3], 128  }
  0x2c   : > { %976 = vsyncadd (%p1171_p9), [#allocation3], 4294967168  ;;  %s754_s11 = sshll.u32 %s979_s15, 4  ;;  %v924_v0 = vld [vmem:[#allocation2] sm:$0xff]   ;;  %vm336_vm0 = vcmask 130048  }
  0x2d   : > { %p251_p3 = scmp.lt.s32.totalorder %s754_s11, 31  ;;  %867 = vmatprep.subr.bf16.mxu0 %v924_v0  ;;  %885 = vmatprep.subr.bf16.mxu1 %v924_v0  ;;  %v1096_v9 = vld [vmem:[%s1161_s2] ss:$0 sm:$0xff] }
  0x2e   : > { %868 = vmatpush3.bf16.msra.mxu0 %v924_v0  ;;  %886 = vmatpush3.bf16.msra.mxu1 %v924_v0  ;;  %v1101_v11 = vld [vmem:[%s1162_s3] ss:$0 sm:$0xff] }
  0x2f   : > { %s1177_s11 = smov (!%p251_p3, %s754_s11), 31 }
  0x30   : > { %s755_s12 = sshll.u32 %s1177_s11, 2 }
  0x31   : > { %s254_s18 = scalar_lea.vmem %s1159_s0, %s755_s12  ;;  %s1124_s25 = scalar_lea.vmem %s1163_s4, %s755_s12 }
  0x32   : > { %v925_v1 = vld [vmem:[%s254_s18] sm:$0xff]   ;;  %v927_v3 = vld [vmem:[%s254_s18 + $0x8] sm:$0xff]   ;;  %v929_v5 = vld [vmem:[%s254_s18 + $0x10] sm:$0xff]  }
  0x33   : > { %v926_v2 = vld [vmem:[%s254_s18 + $0x20] sm:$0xff]   ;;  %869 = vmatprep.mubr.msk.bf16.mxu0 %vm336_vm0, %v925_v1  ;;  %v928_v4 = vld [vmem:[%s254_s18 + $0x28] sm:$0xff]   ;;  %v930_v6 = vld [vmem:[%s254_s18 + $0x30] sm:$0xff]  }
  0x34   : > { %877 = vmatprep.mubr.msk.bf16.mxu1 %vm336_vm0, %v926_v2  ;;  %870 = vmatmul.mubr.msk.bf16.vlgmr.msra.gmra.mrb[0].mxu0 %vm336_vm0, %v927_v3  ;;  %v931_v7 = vld [vmem:[%s254_s18 + $0x18] sm:$0xff]  }
  0x35   : > { %878 = vmatmul.mubr.msk.bf16.vlgmr.msra.gmra.mrb[0].mxu1 %vm336_vm0, %v928_v4  ;;  %873 = vmatprep.mubr.msk.bf16.mxu0 %vm336_vm0, %v929_v5  ;;  %v932_v8 = vld [vmem:[%s254_s18 + $0x38] sm:$0xff]  }
  0x36   : > { %881 = vmatprep.mubr.msk.bf16.mxu1 %vm336_vm0, %v930_v6 }
  0x3c   : > { %874 = vmatmul.mubr.msk.bf16.gmra.mrb[4].mxu0 %vm336_vm0, %v931_v7 }
  0x3d   : > { %882 = vmatmul.mubr.msk.bf16.gmra.mrb[4].mxu1 %vm336_vm0, %v932_v8 }
 0x107   : > { %v871_v10 = vpop.f32.mrb[0].mxu0 }
 0x108   : > { %v879_v12 = vpop.f32.mrb[0].mxu1  ;;  %v467_v13 = vmul.f32 %v871_v10, %v1096_v9  ;;  %v395_v15 = vpop.f32.mrb[1].mxu0 }
 0x109   : > { %v475_v14 = vmul.f32 %v879_v12, %v1096_v9  ;;  %v427_v16 = vpop.f32.mrb[1].mxu1  ;;  %v465_v17 = vmul.f32 %v1096_v9, %v395_v15  ;;  %v872_v19 = vpop.f32.mrb[2].mxu0 }
 0x10a   : > { %v473_v18 = vmul.f32 %v1096_v9, %v427_v16  ;;  %v880_v20 = vpop.f32.mrb[2].mxu1  ;;  %v490_v21 = vadd.f32 %v1101_v11, %v467_v13  ;;  %v468_v23 = vmul.f32 %v872_v19, %v1096_v9  ;;  %v398_v25 = vpop.f32.mrb[3].mxu0 }
 0x10b   : > { %v498_v22 = vadd.f32 %v1101_v11, %v475_v14  ;;  %v476_v24 = vmul.f32 %v880_v20, %v1096_v9  ;;  %v430_v26 = vpop.f32.mrb[3].mxu1  ;;  %v488_v27 = vadd.f32 %v1101_v11, %v465_v17  ;;  %v466_v29 = vmul.f32 %v1096_v9, %v398_v25 }
 0x10c   : > { %v496_v28 = vadd.f32 %v1101_v11, %v473_v18  ;;  %v474_v30 = vmul.f32 %v1096_v9, %v430_v26  ;;  %vm506_vm1 = vcmp.ge.f32.partialorder %v490_v21, 0.0  ;;  %v522_v31 = vmul.f32 0.2, %v490_v21 }
 0x10d   : > { %vm514_vm2 = vcmp.ge.f32.partialorder %v498_v22, 0.0  ;;  %v530_v32 = vmul.f32 0.2, %v498_v22  ;;  %vm504_vm3 = vcmp.ge.f32.partialorder %v488_v27, 0.0  ;;  %v520_v33 = vmul.f32 0.2, %v488_v27 }
 0x10e   : > { %vm512_vm4 = vcmp.ge.f32.partialorder %v496_v28, 0.0  ;;  %v528_v34 = vmul.f32 0.2, %v496_v28  ;;  %v538_v35 = vsel %vm506_vm1, %v490_v21, %v522_v31  ;;  %v491_v37 = vadd.f32 %v1101_v11, %v468_v23 }
 0x10f   : > { %v546_v36 = vsel %vm514_vm2, %v498_v22, %v530_v32  ;;  %v499_v38 = vadd.f32 %v1101_v11, %v476_v24  ;;  %v536_v39 = vsel %vm504_vm3, %v488_v27, %v520_v33  ;;  %v489_v41 = vadd.f32 %v1101_v11, %v466_v29  ;;  %v875_v43 = vpop.f32.mrb[4].mxu0 }
 0x110   : > { %v544_v40 = vsel %vm512_vm4, %v496_v28, %v528_v34  ;;  %v497_v42 = vadd.f32 %v1101_v11, %v474_v30  ;;  %v883_v44 = vpop.f32.mrb[4].mxu1  ;;  %vm507_vm5 = vcmp.ge.f32.partialorder %v491_v37, 0.0  ;;  %v523_v45 = vmul.f32 0.2, %v491_v37  ;;  %v411_v53 = vpop.f32.mrb[5].mxu0 }
 0x111   : > { %vm515_vm6 = vcmp.ge.f32.partialorder %v499_v38, 0.0  ;;  %v531_v46 = vmul.f32 0.2, %v499_v38  ;;  %vm505_vm7 = vcmp.ge.f32.partialorder %v489_v41, 0.0  ;;  %v521_v47 = vmul.f32 0.2, %v489_v41 }
 0x112   : > { %vm513_vm8 = vcmp.ge.f32.partialorder %v497_v42, 0.0  ;;  %v529_v48 = vmul.f32 0.2, %v497_v42  ;;  %v539_v49 = vsel %vm507_vm5, %v491_v37, %v523_v45  ;;  %v471_v51 = vmul.f32 %v875_v43, %v1096_v9  ;;  %v443_v54 = vpop.f32.mrb[5].mxu1  ;;  %v876_v59 = vpop.f32.mrb[6].mxu0 }
 0x113   : > { %v547_v50 = vsel %vm515_vm6, %v499_v38, %v531_v46  ;;  %v479_v52 = vmul.f32 %v883_v44, %v1096_v9  ;;  %v819_v55 = vpack.c.bf16 %v539_v49, %v538_v35  ;;  %v537_v57 = vsel %vm505_vm7, %v489_v41, %v521_v47  ;;  %v884_v60 = vpop.f32.mrb[6].mxu1  ;;  %v414_v1 = vpop.f32.mrb[7].mxu0 }
 0x114   : > { %v839_v56 = vpack.c.bf16 %v547_v50, %v546_v36  ;;  %v545_v58 = vsel %vm513_vm8, %v497_v42, %v529_v48  ;;  %v814_v61 = vpack.c.bf16 %v537_v57, %v536_v39  ;;  %v494_v63 = vadd.f32 %v1101_v11, %v471_v51  ;;  %v446_v2 = vpop.f32.mrb[7].mxu1 }
 0x115   : > { %v834_v62 = vpack.c.bf16 %v545_v58, %v544_v40  ;;  %v502_v0 = vadd.f32 %v1101_v11, %v479_v52  ;;  %851 = vst [vmem:[%s1124_s25 + $0x8] sm:$0xff] %v819_v55   ;;  %v469_v3 = vmul.f32 %v1096_v9, %v411_v53  ;;  %v477_v4 = vmul.f32 %v1096_v9, %v443_v54 }
 0x116   : > { %855 = vst [vmem:[%s1124_s25 + $0x28] sm:$0xff] %v839_v56   ;;  %v472_v5 = vmul.f32 %v876_v59, %v1096_v9  ;;  %v480_v6 = vmul.f32 %v884_v60, %v1096_v9  ;;  %815 = vst [vmem:[%s1124_s25] sm:$0xff] %v814_v61   ;;  %vm510_vm9 = vcmp.ge.f32.partialorder %v494_v63, 0.0  ;;  %v526_v7 = vmul.f32 0.2, %v494_v63 }
 0x117   : > { %854 = vst [vmem:[%s1124_s25 + $0x20] sm:$0xff] %v834_v62   ;;  %vm518_vm10 = vcmp.ge.f32.partialorder %v502_v0, 0.0  ;;  %v534_v8 = vmul.f32 0.2, %v502_v0  ;;  %v492_v10 = vadd.f32 %v1101_v11, %v469_v3  ;;  %v500_v14 = vadd.f32 %v1101_v11, %v477_v4 }
 0x118   : > { %v495_v12 = vadd.f32 %v1101_v11, %v472_v5  ;;  %v503_v13 = vadd.f32 %v1101_v11, %v480_v6  ;;  %v470_v15 = vmul.f32 %v1096_v9, %v414_v1  ;;  %v478_v16 = vmul.f32 %v1096_v9, %v446_v2 }
 0x119   : > { %v542_v17 = vsel %vm510_vm9, %v494_v63, %v526_v7  ;;  %v550_v18 = vsel %vm518_vm10, %v502_v0, %v534_v8  ;;  %vm508_vm13 = vcmp.ge.f32.partialorder %v492_v10, 0.0  ;;  %v524_v21 = vmul.f32 0.2, %v492_v10 }
 0x11a   : > { %vm511_vm11 = vcmp.ge.f32.partialorder %v495_v12, 0.0  ;;  %v527_v19 = vmul.f32 0.2, %v495_v12  ;;  %vm519_vm12 = vcmp.ge.f32.partialorder %v503_v13, 0.0  ;;  %v535_v20 = vmul.f32 0.2, %v503_v13 }
 0x11b   : > { %v493_v22 = vadd.f32 %v1101_v11, %v470_v15  ;;  %v501_v23 = vadd.f32 %v1101_v11, %v478_v16  ;;  %vm516_vm14 = vcmp.ge.f32.partialorder %v500_v14, 0.0  ;;  %v532_v24 = vmul.f32 0.2, %v500_v14 }
 0x11c   : > { %v543_v25 = vsel %vm511_vm11, %v495_v12, %v527_v19  ;;  %v551_v26 = vsel %vm519_vm12, %v503_v13, %v535_v20  ;;  %v540_v30 = vsel %vm508_vm13, %v492_v10, %v524_v21 }
 0x11d   : > { %v829_v9 = vpack.c.bf16 %v543_v25, %v542_v17  ;;  %v849_v27 = vpack.c.bf16 %v551_v26, %v550_v18  ;;  %vm509_vm15 = vcmp.ge.f32.partialorder %v493_v22, 0.0  ;;  %v525_v28 = vmul.f32 0.2, %v493_v22 }
 0x11e   : > { %vm517_vm0 = vcmp.ge.f32.partialorder %v501_v23, 0.0  ;;  %v533_v29 = vmul.f32 0.2, %v501_v23  ;;  %v548_v32 = vsel %vm516_vm14, %v500_v14, %v532_v24 }
 0x11f   : > { %853 = vst [vmem:[%s1124_s25 + $0x18] sm:$0xff] %v829_v9   ;;  %857 = vst [vmem:[%s1124_s25 + $0x38] sm:$0xff] %v849_v27   ;;  %v541_v31 = vsel %vm509_vm15, %v493_v22, %v525_v28 }
 0x120   : > { %v824_v33 = vpack.c.bf16 %v541_v31, %v540_v30  ;;  %v549_v34 = vsel %vm517_vm0, %v501_v23, %v533_v29 }
 0x121   : > { %v844_v11 = vpack.c.bf16 %v549_v34, %v548_v32 }
 0x122   : > { %852 = vst [vmem:[%s1124_s25 + $0x10] sm:$0xff] %v824_v33  }
 0x123   : > { %856 = vst [vmem:[%s1124_s25 + $0x30] sm:$0xff] %v844_v11  }
 0x124 PF: > { %s15_s17 = sadd.s32 1, %s987_s17   ;;  %s1172_s15 = smov %s983_s16 }
 0x125   : > { %p12_p4 = scmp.ge.s32.totalorder %s15_s17, 4   ;;  %s1173_s16 = smov %s1175_s19 }
 0x127   :  { %14 = sbr.rel (!%p12_p4) target bundleno = 2 (0x2), region = 78 }
 0x12e   :  { %660 = vsyncpa [#allocation3], 1 }
 0x12f   :  { %662 = vsyncpa [#allocation3 + $0x1], 1 }

// kernel: generator_forward.17
= control target key start
LH: loop header
LB: loop body
LE: loop exit
PB: predicated region body
PF: predicated region fallthrough
CT: control target
= control target key end

     0   :  { %8 = vsyncpa [#allocation3], 0  ;;  %s1087_s0 = inlined_call_operand.vmem [shape: bf16[1024,8], index: 0, kind: input, shape index: {}]   ;;  %s1088_s1 = inlined_call_operand.hbm [shape: bf16[8,128], index: 1, kind: input, shape index: {}]   ;;  %s1089_s2 = inlined_call_operand.hbm [shape: f32[1,128], index: 2, kind: input, shape index: {}]   ;;  %s1090_s3 = inlined_call_operand.vmem [shape: bf16[1024,128], index: 3, kind: output, shape index: {}]  }
   0x1   :  { %9 = vsyncpa [#allocation5], 0  ;;  %s959_s12 = smov 0   ;;  %s961_s13 = smov 0  }
   0x2   :  { %s963_s14 = smov 0  }
   0x3 LB: > { %s622_s15 = sadd.s32 4294967295, %s935_s14   ;;  %s27_s16 = sadd.s32 1, %s931_s13  ;;  %s935_s14 = sphi %s963_s14, %s15_s14   ;;  %s931_s13 = sphi %s961_s13, %s1100_s13   ;;  %s927_s12 = sphi %s959_s12, %s1099_s12  }
   0x4   : > { %p29_p0 = scmp.ge.s32.totalorder %s27_s16, 8  ;;  %p624_p1 = scmp.ge.s32.totalorder %s935_s14, 1 }
   0x5   : > { %p138_p2 = scmp.lt.s32.totalorder %s935_s14, 9  ;;  %p984_p4 = scmp.eq.s32.totalorder %s622_s15, 0 }
   0x6   : > { %s1102_s16 = smov (%p29_p0, %s27_s16), 0  ;;  %s937_s19 = smov [#allocation2]  }
   0x7   : > { %p980_p3 = pnand %p624_p1, %p138_p2  ;;  %s153_s20 = sshll.u32 %s937_s19, 4  ;;  %s154_s20 = int_to_ptr.vmem [resolvable:$true] %s153_s20 }
   0x8   : > { %s1095_s18 = scalar_select %p984_p4, 1, 0 }
   0x9   : > { %s1094_s17 = scalar_select %p980_p3, 1, 0 }
   0xa   : > { %p772_p5 = pneg %p980_p3  ;;  %s938_s21 = smov [#allocation4]  }
   0xb   : > { %s166_s22 = sshll.u32 %s938_s21, 4  ;;  %s849_s26 = scalar_lea.hbm %s1088_s1, 64  ;;  %s996_s22 = int_to_ptr.vmem [resolvable:$true] %s166_s22 }
   0xc   : > { %p992_p6 = pnand %p984_p4, %p772_p5  ;;  %p850_p7 = scmp.ne.s32.totalorder %s1088_s1, %s849_s26 }
   0xd   : > { %p856_p11 = scmp.lt.u32.totalorder %s849_s26, %s1088_s1 }
   0xe   : > { %p851_p8 = pneg %p992_p6 }
  0x10   : > { %p852_p9 = pnand %p851_p8, %p850_p7 }
  0x12   : > { %p853_p10 = pneg %p852_p9 }
  0x14   : > { %p858_p12 = pnand %p856_p11, %p853_p10 }
  0x16   : > { %861 = shalt.err (!%p858_p12)
}
  0x17   : > { %s862_s4 = scalar_lea.vmem %s154_s20, 64  ;;  %p870_p2 = scmp.lt.s32.totalorder %s154_s20, %s154_s20 }
  0x18   : > { %p863_p13 = scmp.ne.s32.totalorder %s154_s20, %s862_s4  ;;  %p871_p5 = scmp.lt.s32.totalorder %s862_s4, %s862_s4 }
  0x1a   : > { %p865_p0 = pnand %p863_p13, %p851_p8  ;;  %p872_p4 = por %p871_p5, %p870_p2 }
  0x1c   : > { %p866_p1 = pneg %p865_p0 }
  0x1e   : > { %p873_p3 = pnand %p872_p4, %p866_p1 }
  0x20   : > { %876 = shalt.err (!%p873_p3)
}
  0x21   : > { %775 = dma.hbm_to_vmem [thread:$0]  (!%p992_p6), %s1088_s1, 64, %s154_s20, [#allocation3]  }
  0x22   : > { %s877_s9 = scalar_lea.hbm %s1089_s2, 16 }
  0x23   : > { %p878_p7 = scmp.ne.s32.totalorder %s1089_s2, %s877_s9  ;;  %p884_p3 = scmp.lt.u32.totalorder %s877_s9, %s1089_s2 }
  0x25   : > { %p880_p9 = pnand %p878_p7, %p851_p8 }
  0x27   : > { %p881_p4 = pneg %p880_p9 }
  0x29   : > { %p886_p10 = pnand %p884_p3, %p881_p4 }
  0x2b   : > { %889 = shalt.err (!%p886_p10)
}
  0x2c   : > { %s890_s20 = scalar_lea.vmem %s996_s22, 16  ;;  %s897_s21 = scalar_lea.vmem %s996_s22, 32 }
  0x2d   : > { %p891_p11 = scmp.ne.s32.totalorder %s996_s22, %s890_s20  ;;  %p898_p0 = scmp.lt.s32.totalorder %s996_s22, %s996_s22 }
  0x2e   : > { %p899_p1 = scmp.lt.s32.totalorder %s897_s21, %s890_s20 }
  0x2f   : > { %p893_p12 = pnand %p891_p11, %p851_p8 }
  0x30   : > { %p900_p2 = por %p899_p1, %p898_p0 }
  0x31   : > { %p894_p13 = pneg %p893_p12 }
  0x33   : > { %p901_p5 = pnand %p900_p2, %p894_p13 }
  0x35   : > { %904 = shalt.err (!%p901_p5)
}
  0x36   : > { %778 = dma.hbm_to_vmem [thread:$0]  (!%p992_p6), %s1089_s2, 16, %s996_s22, [#allocation5]  }
  0x37   : > { %p1097_p7 = scmp.ne.s32.totalorder %s1094_s17, 0 }
  0x38   : > { %p1098_p8 = scmp.ne.s32.totalorder (!%p1097_p7), %s1095_s18, 0 }
  0x39   : > { %188 = sbr.rel (%p1097_p7) target bundleno = 318 (0x13e), region = 32 }
  0x40   : > { %918 = dma.done.wait (%p1098_p8), [#allocation3], 64  }
  0x41   : > { %920 = vsyncadd (%p1098_p8), [#allocation3], 4294967232 }
  0x42   : > { %922 = dma.done.wait (%p1098_p8), [#allocation5], 16  }
  0x43   : > { %924 = vsyncadd (%p1098_p8), [#allocation5], 4294967280  ;;  %s631_s23 = sshll.u32 %s927_s12, 4  ;;  %vm324_vm0 = vcmask 1043456   ;;  %vm299_vm1 = vcmask 64512  }
  0x44   : > { %p220_p9 = scmp.lt.s32.totalorder %s631_s23, 127  ;;  %v251_v0 = vld [vmem:[#allocation2] sm:$0xf]  ;;  %v635_v10 = vld [vmem:[#allocation4] ss:$0 sm:$0xff] }
  0x45   : > { %762 = vmatprep.subr.msk.bf16.mxu0 %vm324_vm0, %v251_v0  ;;  %763 = vmatprep.subr.msk.bf16.mxu1 %vm324_vm0, %v251_v0  ;;  %v326_v1 = vsel %vm324_vm0, %v251_v0, 0 }
  0x46   : > { %s1104_s23 = smov (!%p220_p9, %s631_s23), 127  ;;  %743 = vmatpush3.bf16.msra.mxu0 %v326_v1  ;;  %761 = vmatpush3.bf16.msra.mxu1 %v326_v1 }
  0x47   : > { %s632_s17 = sshll.u32 %s1104_s23, 2 }
  0x48   : > { %s223_s27 = scalar_lea.vmem %s1087_s0, %s632_s17  ;;  %s232_s28 = scalar_lea.vmem %s1090_s3, %s632_s17 }
  0x49   : > { %v809_v2 = vld [vmem:[%s223_s27] sm:$0xff]   ;;  %v811_v4 = vld [vmem:[%s223_s27 + $0x8] sm:$0xff]   ;;  %v813_v6 = vld [vmem:[%s223_s27 + $0x10] sm:$0xff]  }
  0x4a   : > { %v810_v3 = vld [vmem:[%s223_s27 + $0x20] sm:$0xff]   ;;  %744 = vmatprep.mubr.msk.bf16.mxu0 %vm299_vm1, %v809_v2  ;;  %v812_v5 = vld [vmem:[%s223_s27 + $0x28] sm:$0xff]   ;;  %v814_v7 = vld [vmem:[%s223_s27 + $0x30] sm:$0xff]  }
  0x4b   : > { %752 = vmatprep.mubr.msk.bf16.mxu1 %vm299_vm1, %v810_v3  ;;  %745 = vmatmul.mubr.msk.bf16.vlgmr.msra.gmra.mrb[0].mxu0 %vm299_vm1, %v811_v4  ;;  %v815_v8 = vld [vmem:[%s223_s27 + $0x18] sm:$0xff]  }
  0x4c   : > { %753 = vmatmul.mubr.msk.bf16.vlgmr.msra.gmra.mrb[0].mxu1 %vm299_vm1, %v812_v5  ;;  %748 = vmatprep.mubr.msk.bf16.mxu0 %vm299_vm1, %v813_v6  ;;  %v816_v9 = vld [vmem:[%s223_s27 + $0x38] sm:$0xff]  }
  0x4d   : > { %756 = vmatprep.mubr.msk.bf16.mxu1 %vm299_vm1, %v814_v7 }
  0x53   : > { %749 = vmatmul.mubr.msk.bf16.gmra.mrb[4].mxu0 %vm299_vm1, %v815_v8 }
  0x54   : > { %757 = vmatmul.mubr.msk.bf16.gmra.mrb[4].mxu1 %vm299_vm1, %v816_v9 }
 0x11e   : > { %v746_v11 = vpop.f32.mrb[0].mxu0 }
 0x11f   : > { %v371_v12 = vadd.f32 %v746_v11, %v635_v10  ;;  %v754_v13 = vpop.f32.mrb[0].mxu1  ;;  %v362_v14 = vpop.f32.mrb[1].mxu0 }
 0x120   : > { %v403_v15 = vadd.f32 %v754_v13, %v635_v10  ;;  %v363_v16 = vadd.f32 %v635_v10, %v362_v14  ;;  %v394_v17 = vpop.f32.mrb[1].mxu1  ;;  %v747_v18 = vpop.f32.mrb[2].mxu0 }
 0x121   : > { %817 = vtanh.f32 %v371_v12  ;;  %v395_v19 = vadd.f32 %v635_v10, %v394_v17  ;;  %v374_v20 = vadd.f32 %v747_v18, %v635_v10  ;;  %v755_v21 = vpop.f32.mrb[2].mxu1  ;;  %v365_v22 = vpop.f32.mrb[3].mxu0 }
 0x122   : > { %819 = vtanh.f32 %v403_v15  ;;  %v406_v23 = vadd.f32 %v755_v21, %v635_v10  ;;  %v397_v24 = vpop.f32.mrb[3].mxu1  ;;  %v366_v25 = vadd.f32 %v635_v10, %v365_v22 }
 0x123   : > { %821 = vtanh.f32 %v363_v16  ;;  %v398_v26 = vadd.f32 %v635_v10, %v397_v24 }
 0x124   : > { %823 = vtanh.f32 %v395_v19 }
 0x125   : > { %825 = vtanh.f32 %v374_v20 }
 0x126   : > { %827 = vtanh.f32 %v406_v23  ;;  %v750_v27 = vpop.f32.mrb[4].mxu0 }
 0x127   : > { %829 = vtanh.f32 %v366_v25  ;;  %v387_v28 = vadd.f32 %v750_v27, %v635_v10  ;;  %v758_v29 = vpop.f32.mrb[4].mxu1  ;;  %v378_v30 = vpop.f32.mrb[5].mxu0 }
 0x128   : > { %831 = vtanh.f32 %v398_v26  ;;  %v419_v31 = vadd.f32 %v758_v29, %v635_v10  ;;  %v379_v32 = vadd.f32 %v635_v10, %v378_v30  ;;  %v410_v33 = vpop.f32.mrb[5].mxu1  ;;  %v751_v34 = vpop.f32.mrb[6].mxu0 }
 0x129   : > { %833 = vtanh.f32 %v387_v28  ;;  %v411_v35 = vadd.f32 %v635_v10, %v410_v33  ;;  %v390_v36 = vadd.f32 %v751_v34, %v635_v10  ;;  %v759_v37 = vpop.f32.mrb[6].mxu1  ;;  %v381_v38 = vpop.f32.mrb[7].mxu0 }
 0x12a   : > { %835 = vtanh.f32 %v419_v31  ;;  %v422_v39 = vadd.f32 %v759_v37, %v635_v10  ;;  %v413_v40 = vpop.f32.mrb[7].mxu1  ;;  %v382_v42 = vadd.f32 %v635_v10, %v381_v38 }
 0x12b   : > { %v818_v41 = vpop.eup %817  ;;  %837 = vtanh.f32 %v379_v32  ;;  %v414_v44 = vadd.f32 %v635_v10, %v413_v40 }
 0x12c   : > { %v820_v43 = vpop.eup %819  ;;  %839 = vtanh.f32 %v411_v35 }
 0x12d   : > { %v822_v45 = vpop.eup %821  ;;  %841 = vtanh.f32 %v390_v36 }
 0x12e   : > { %v824_v46 = vpop.eup %823  ;;  %843 = vtanh.f32 %v422_v39 }
 0x12f   : > { %v826_v47 = vpop.eup %825  ;;  %845 = vtanh.f32 %v382_v42 }
 0x130   : > { %v828_v48 = vpop.eup %827  ;;  %v694_v49 = vpack.c.bf16 %v826_v47, %v818_v41  ;;  %847 = vtanh.f32 %v414_v44 }
 0x131   : > { %v830_v50 = vpop.eup %829  ;;  %v714_v51 = vpack.c.bf16 %v828_v48, %v820_v43 }
 0x132   : > { %v832_v52 = vpop.eup %831  ;;  %726 = vst [vmem:[%s232_s28 + $0x8] sm:$0xff] %v694_v49   ;;  %v689_v53 = vpack.c.bf16 %v830_v50, %v822_v45 }
 0x133   : > { %v834_v54 = vpop.eup %833  ;;  %730 = vst [vmem:[%s232_s28 + $0x28] sm:$0xff] %v714_v51   ;;  %v709_v55 = vpack.c.bf16 %v832_v52, %v824_v46 }
 0x134   : > { %v836_v56 = vpop.eup %835  ;;  %690 = vst [vmem:[%s232_s28] sm:$0xff] %v689_v53  }
 0x135   : > { %v838_v57 = vpop.eup %837  ;;  %729 = vst [vmem:[%s232_s28 + $0x20] sm:$0xff] %v709_v55  }
 0x136   : > { %v840_v58 = vpop.eup %839 }
 0x137   : > { %v842_v59 = vpop.eup %841 }
 0x138   : > { %v844_v60 = vpop.eup %843  ;;  %v704_v61 = vpack.c.bf16 %v842_v59, %v834_v54 }
 0x139   : > { %v846_v62 = vpop.eup %845  ;;  %v724_v63 = vpack.c.bf16 %v844_v60, %v836_v56 }
 0x13a   : > { %v848_v0 = vpop.eup %847  ;;  %728 = vst [vmem:[%s232_s28 + $0x18] sm:$0xff] %v704_v61   ;;  %v699_v1 = vpack.c.bf16 %v846_v62, %v838_v57 }
 0x13b   : > { %732 = vst [vmem:[%s232_s28 + $0x38] sm:$0xff] %v724_v63   ;;  %v719_v2 = vpack.c.bf16 %v848_v0, %v840_v58 }
 0x13c   : > { %727 = vst [vmem:[%s232_s28 + $0x10] sm:$0xff] %v699_v1  }
 0x13d   : > { %731 = vst [vmem:[%s232_s28 + $0x30] sm:$0xff] %v719_v2  }
 0x13e PF: > { %s15_s14 = sadd.s32 1, %s935_s14   ;;  %s1099_s12 = smov %s931_s13 }
 0x13f   : > { %p12_p6 = scmp.ge.s32.totalorder %s15_s14, 10   ;;  %s1100_s13 = smov %s1102_s16 }
 0x141   :  { %14 = sbr.rel (!%p12_p6) target bundleno = 3 (0x3), region = 73 }
 0x148   :  { %549 = vsyncpa [#allocation3], 1 }
 0x149   :  { %551 = vsyncpa [#allocation3 + $0x1], 1 }
 0x14a   :  { %552 = vsyncpa [#allocation5], 1 }

</bundles_post_ra>
